<compile_context>
chip_gen: v7x
topology: tpu7x:2x2x1
jax: 0.10.0
libtpu: 0.0.40
codegen_flags: <defaults>
</compile_context>

<pallas_src>
import functools

import jax
import jax.numpy as jnp
from jax.experimental import pallas as pl
from jax.experimental.pallas import tpu as pltpu


_LANE_TILE = 512   # lanes of (batch * pooled-spatial) per conv grid step
_FC_PAD = 128      # FC widths padded to full lanes (unmasked stores)


def _round_up(x, m):
    return (x + m - 1) // m * m


# ---------------------------------------------------------------------------
# Fused conv + bias + ReLU + 2x2 max-pool kernel
# ---------------------------------------------------------------------------
def _conv_pool_kernel(w_ref, b_ref, p_ref, o_ref, *, n_phases):
    # w: (OC, K), b: (OC, 1), p: (n_phases, K, TM), o: (OC, TM)
    acc = jnp.dot(w_ref[...], p_ref[0], preferred_element_type=jnp.float32)
    for q in range(1, n_phases):
        acc = jnp.maximum(
            acc, jnp.dot(w_ref[...], p_ref[q], preferred_element_type=jnp.float32))
    # pool(relu(conv + b)) == relu(max_phases(conv) + b)  (both monotone)
    o_ref[...] = jnp.maximum(acc + b_ref[...], 0.0).astype(o_ref.dtype)


def conv_relu_pool(x, w, b):
    """Fused Conv2d(stride 1, valid) + bias + ReLU + MaxPool2d(2, 2).

    x: (N, C, H, W) NCHW; w: (OC, C, KH, KW) torch layout; b: (OC,).
    Returns (N, OC, OH // 2, OW // 2).
    """
    n, c, h, wdt = x.shape
    oc, ic, kh, kw = w.shape
    assert ic == c
    oh, ow = h - kh + 1, wdt - kw + 1
    assert oh % 2 == 0 and ow % 2 == 0, "MaxPool2d(2,2) needs even conv output"
    ph, pw = oh // 2, ow // 2
    m = n * ph * pw
    k = c * kh * kw

    # Pooling-phase im2col (plain-JAX glue on the *input* only): phases[d] is a
    # (K, M) patch matrix for pooling phase d, K ordered (c, kh, kw) to match
    # the torch weight flatten, M ordered (n, ph, pw).
    phases = []
    for dh in range(2):
        for dw in range(2):
            cols = []
            for i in range(kh):
                for j in range(kw):
                    r0, c0 = dh + i, dw + j
                    cols.append(
                        x[:, :, r0:r0 + 2 * (ph - 1) + 1:2,
                              c0:c0 + 2 * (pw - 1) + 1:2])       # (N, C, PH, PW)
            p = jnp.stack(cols, axis=2)                           # (N, C, KH*KW, PH, PW)
            p = p.transpose(1, 2, 0, 3, 4).reshape(k, m)          # (K, M)
            phases.append(p)
    patches = jnp.stack(phases, axis=0)                           # (4, K, M)

    tm = min(_LANE_TILE, _round_up(m, 128))
    m_pad = _round_up(m, tm)
    if m_pad != m:
        patches = jnp.pad(patches, ((0, 0), (0, 0), (0, m_pad - m)))

    wf = w.reshape(oc, k).astype(jnp.float32)                     # (OC, K)
    bc = b.reshape(oc, 1).astype(jnp.float32)                     # (OC, 1)

    out = pl.pallas_call(
        functools.partial(_conv_pool_kernel, n_phases=4),
        out_shape=jax.ShapeDtypeStruct((oc, m_pad), jnp.float32),
        grid=(m_pad // tm,),
        in_specs=[
            pl.BlockSpec((oc, k), lambda i: (0, 0)),
            pl.BlockSpec((oc, 1), lambda i: (0, 0)),
            pl.BlockSpec((4, k, tm), lambda i: (0, 0, i)),
        ],
        out_specs=pl.BlockSpec((oc, tm), lambda i: (0, i)),
        compiler_params=pltpu.CompilerParams(
            dimension_semantics=("parallel",),
            vmem_limit_bytes=32 * 1024 * 1024),
    )(wf, bc, patches)

    out = out[:, :m].reshape(oc, n, ph, pw)                       # drop lane pad
    return out.transpose(1, 0, 2, 3)                              # (N, OC, PH, PW)


# ---------------------------------------------------------------------------
# Fused fc1 -> ReLU -> fc2 -> ReLU -> fc3 kernel
# ---------------------------------------------------------------------------
def _fc_fused_kernel(x_ref, w1_ref, b1_ref, w2_ref, b2_ref, w3_ref, b3_ref, o_ref):
    h = jnp.dot(x_ref[...], w1_ref[...], preferred_element_type=jnp.float32) + b1_ref[...]
    h = jnp.maximum(h, 0.0)
    h = jnp.dot(h, w2_ref[...], preferred_element_type=jnp.float32) + b2_ref[...]
    h = jnp.maximum(h, 0.0)
    o_ref[...] = (jnp.dot(h, w3_ref[...], preferred_element_type=jnp.float32)
                  + b3_ref[...]).astype(o_ref.dtype)


def fc_fused(x, w1, b1, w2, b2, w3, b3, out_dim):
    n = x.shape[0]
    n_pad = w3.shape[1]
    out = pl.pallas_call(
        _fc_fused_kernel,
        out_shape=jax.ShapeDtypeStruct((n, n_pad), jnp.float32),
        in_specs=[pl.BlockSpec(memory_space=pltpu.MemorySpace.VMEM)] * 7,
        out_specs=pl.BlockSpec(memory_space=pltpu.MemorySpace.VMEM),
    )(x, w1, b1, w2, b2, w3, b3)
    return out[:, :out_dim]


# ---------------------------------------------------------------------------
# Parameters (deterministic PyTorch-style uniform(+-1/sqrt(fan_in)) init)
# ---------------------------------------------------------------------------
def init_params(key):
    def uni(k, shape, fan_in):
        bound = 1.0 / float(fan_in) ** 0.5
        return jax.random.uniform(k, shape, jnp.float32, -bound, bound)

    ks = jax.random.split(key, 10)
    return {
        "conv1_w": uni(ks[0], (6, 3, 5, 5), 3 * 5 * 5),
        "conv1_b": uni(ks[1], (6,), 3 * 5 * 5),
        "conv2_w": uni(ks[2], (16, 6, 5, 5), 6 * 5 * 5),
        "conv2_b": uni(ks[3], (16,), 6 * 5 * 5),
        "fc1_w": uni(ks[4], (120, 16 * 5 * 5), 16 * 5 * 5),
        "fc1_b": uni(ks[5], (120,), 16 * 5 * 5),
        "fc2_w": uni(ks[6], (84, 120), 120),
        "fc2_b": uni(ks[7], (84,), 120),
        "fc3_w": uni(ks[8], (10, 84), 84),
        "fc3_b": uni(ks[9], (10,), 84),
    }


def prepare_params(params):
    """One-time layout prep outside the jitted forward: pre-transpose FC weights
    to (in, out) and zero-pad FC widths to 128 lanes (lane-dense stores)."""
    def padded_fc(w, b, rows_pad, cols_pad):
        wt = w.T  # (in, out)
        wt = jnp.pad(wt, ((0, rows_pad - wt.shape[0]), (0, cols_pad - wt.shape[1])))
        bp = jnp.pad(b, (0, cols_pad - b.shape[0])).reshape(1, cols_pad)
        return wt, bp

    w1, b1 = padded_fc(params["fc1_w"], params["fc1_b"], 16 * 5 * 5, _FC_PAD)
    w2, b2 = padded_fc(params["fc2_w"], params["fc2_b"], _FC_PAD, _FC_PAD)
    w3, b3 = padded_fc(params["fc3_w"], params["fc3_b"], _FC_PAD, _FC_PAD)
    return {
        "conv1_w": params["conv1_w"], "conv1_b": params["conv1_b"],
        "conv2_w": params["conv2_w"], "conv2_b": params["conv2_b"],
        "fc1_w": w1, "fc1_b": b1,
        "fc2_w": w2, "fc2_b": b2,
        "fc3_w": w3, "fc3_b": b3,
    }


# ---------------------------------------------------------------------------
# Forward pass (matches SimpleNetwork.forward)
# ---------------------------------------------------------------------------
def simple_network_forward(params, x):
    x = conv_relu_pool(x, params["conv1_w"], params["conv1_b"])   # (N, 6, 14, 14)
    x = conv_relu_pool(x, params["conv2_w"], params["conv2_b"])   # (N, 16, 5, 5)
    n = x.shape[0]
    x = x.reshape(n, -1)                                          # torch.flatten(x, 1) -> (N, 400)
    return fc_fused(x, params["fc1_w"], params["fc1_b"],
                    params["fc2_w"], params["fc2_b"],
                    params["fc3_w"], params["fc3_b"], out_dim=10)  # (N, 10)


if __name__ == "__main__":
    key = jax.random.PRNGKey(0)
    pkey, xkey = jax.random.split(key)
    params = prepare_params(init_params(pkey))
    # Conv/pool arithmetic (32->28->14->10->5) requires 3x32x32 input (CIFAR).
    x = jax.random.normal(xkey, (2, 3, 32, 32), dtype=jnp.float32)

    fwd = jax.jit(simple_network_forward)
    out = fwd(params, x)
    jax.block_until_ready(out)
    assert out.shape == (2, 10), out.shape
    print("KERNEL_OK")
</pallas_src>

<mosaic_0001>
module attributes {stable_mosaic.version = 11 : i64} {
  func.func @_conv_pool_kernel(%arg0: i32, %arg1: memref<6x75xf32, #tpu.memory_space<vmem>>, %arg2: memref<6x1xf32, #tpu.memory_space<vmem>>, %arg3: memref<4x75x512xf32, #tpu.memory_space<vmem>>, %arg4: memref<6x512xf32, #tpu.memory_space<vmem>>) attributes {dimension_semantics = [#tpu.dimension_semantics<parallel>], iteration_bounds = array<i64: 1>, scalar_prefetch = 0 : i64, scratch_operands = 0 : i64, tpu.core_type = #tpu.core_type<tc>, window_params = [{pipeline_mode = #tpu.pipeline_mode<synchronous>, transform_indices = @transform_0, window_bounds = array<i64: 6, 75>}, {pipeline_mode = #tpu.pipeline_mode<synchronous>, transform_indices = @transform_1, window_bounds = array<i64: 6, 1>}, {transform_indices = @transform_2, window_bounds = array<i64: 4, 75, 512>}, {transform_indices = @transform_3, window_bounds = array<i64: 6, 512>}]} {
    %c0 = arith.constant 0 : index
    %c0_0 = arith.constant 0 : index
    %0 = vector.load %arg1[%c0, %c0_0] : memref<6x75xf32, #tpu.memory_space<vmem>>, vector<6x75xf32>
    %c0_1 = arith.constant 0 : index
    %c0_2 = arith.constant 0 : index
    %c0_3 = arith.constant 0 : index
    %1 = vector.load %arg3[%c0_1, %c0_2, %c0_3] : memref<4x75x512xf32, #tpu.memory_space<vmem>>, vector<1x75x512xf32>
    %2 = vector.shape_cast %1 : vector<1x75x512xf32> to vector<75x512xf32>
    %cst = arith.constant dense<0.000000e+00> : vector<6x512xf32>
    %3 = tpu.matmul %0, %2, %cst {dimension_numbers = #tpu.dot_dimension_numbers<[1], [0], [0], [1], [0, 0, 1, 1], [], []>} : vector<6x75xf32>, vector<75x512xf32>, vector<6x512xf32> -> vector<6x512xf32>
    %c0_4 = arith.constant 0 : index
    %c0_5 = arith.constant 0 : index
    %4 = vector.load %arg1[%c0_4, %c0_5] : memref<6x75xf32, #tpu.memory_space<vmem>>, vector<6x75xf32>
    %c1 = arith.constant 1 : index
    %c0_6 = arith.constant 0 : index
    %c0_7 = arith.constant 0 : index
    %5 = vector.load %arg3[%c1, %c0_6, %c0_7] : memref<4x75x512xf32, #tpu.memory_space<vmem>>, vector<1x75x512xf32>
    %6 = vector.shape_cast %5 : vector<1x75x512xf32> to vector<75x512xf32>
    %cst_8 = arith.constant dense<0.000000e+00> : vector<6x512xf32>
    %7 = tpu.matmul %4, %6, %cst_8 {dimension_numbers = #tpu.dot_dimension_numbers<[1], [0], [0], [1], [0, 0, 1, 1], [], []>} : vector<6x75xf32>, vector<75x512xf32>, vector<6x512xf32> -> vector<6x512xf32>
    %8 = arith.maximumf %3, %7 : vector<6x512xf32>
    %c0_9 = arith.constant 0 : index
    %c0_10 = arith.constant 0 : index
    %9 = vector.load %arg1[%c0_9, %c0_10] : memref<6x75xf32, #tpu.memory_space<vmem>>, vector<6x75xf32>
    %c2 = arith.constant 2 : index
    %c0_11 = arith.constant 0 : index
    %c0_12 = arith.constant 0 : index
    %10 = vector.load %arg3[%c2, %c0_11, %c0_12] : memref<4x75x512xf32, #tpu.memory_space<vmem>>, vector<1x75x512xf32>
    %11 = vector.shape_cast %10 : vector<1x75x512xf32> to vector<75x512xf32>
    %cst_13 = arith.constant dense<0.000000e+00> : vector<6x512xf32>
    %12 = tpu.matmul %9, %11, %cst_13 {dimension_numbers = #tpu.dot_dimension_numbers<[1], [0], [0], [1], [0, 0, 1, 1], [], []>} : vector<6x75xf32>, vector<75x512xf32>, vector<6x512xf32> -> vector<6x512xf32>
    %13 = arith.maximumf %8, %12 : vector<6x512xf32>
    %c0_14 = arith.constant 0 : index
    %c0_15 = arith.constant 0 : index
    %14 = vector.load %arg1[%c0_14, %c0_15] : memref<6x75xf32, #tpu.memory_space<vmem>>, vector<6x75xf32>
    %c3 = arith.constant 3 : index
    %c0_16 = arith.constant 0 : index
    %c0_17 = arith.constant 0 : index
    %15 = vector.load %arg3[%c3, %c0_16, %c0_17] : memref<4x75x512xf32, #tpu.memory_space<vmem>>, vector<1x75x512xf32>
    %16 = vector.shape_cast %15 : vector<1x75x512xf32> to vector<75x512xf32>
    %cst_18 = arith.constant dense<0.000000e+00> : vector<6x512xf32>
    %17 = tpu.matmul %14, %16, %cst_18 {dimension_numbers = #tpu.dot_dimension_numbers<[1], [0], [0], [1], [0, 0, 1, 1], [], []>} : vector<6x75xf32>, vector<75x512xf32>, vector<6x512xf32> -> vector<6x512xf32>
    %18 = arith.maximumf %13, %17 : vector<6x512xf32>
    %c0_19 = arith.constant 0 : index
    %c0_20 = arith.constant 0 : index
    %19 = vector.load %arg2[%c0_19, %c0_20] : memref<6x1xf32, #tpu.memory_space<vmem>>, vector<6x1xf32>
    %20 = vector.broadcast %19 : vector<6x1xf32> to vector<6x512xf32>
    %21 = arith.addf %18, %20 : vector<6x512xf32>
    %cst_21 = arith.constant 0.000000e+00 : f32
    %22 = vector.broadcast %cst_21 : f32 to vector<6x512xf32>
    %23 = arith.maximumf %21, %22 : vector<6x512xf32>
    %c0_22 = arith.constant 0 : index
    %c0_23 = arith.constant 0 : index
    %24 = vector.load %arg4[%c0_22, %c0_23] : memref<6x512xf32, #tpu.memory_space<vmem>>, vector<6x512xf32>
    tpu.vector_store %arg4[%c0_22, %c0_23], %23 {strides = array<i32>} : memref<6x512xf32, #tpu.memory_space<vmem>>, vector<6x512xf32>,
    return
  }
  func.func @transform_0(%arg0: i32) -> (i32, i32) {
    %c0_i32 = arith.constant 0 : i32
    %c0_i32_0 = arith.constant 0 : i32
    %c0_i32_1 = arith.constant 0 : i32
    return %c0_i32, %c0_i32_0 : i32, i32
  }
  func.func @transform_1(%arg0: i32) -> (i32, i32) {
    %c0_i32 = arith.constant 0 : i32
    %c0_i32_0 = arith.constant 0 : i32
    %c0_i32_1 = arith.constant 0 : i32
    return %c0_i32, %c0_i32_0 : i32, i32
  }
  func.func @transform_2(%arg0: i32) -> (i32, i32, i32) {
    %c0_i32 = arith.constant 0 : i32
    %c0_i32_0 = arith.constant 0 : i32
    %c0_i32_1 = arith.constant 0 : i32
    return %c0_i32, %c0_i32_0, %arg0 : i32, i32, i32
  }
  func.func @transform_3(%arg0: i32) -> (i32, i32) {
    %c0_i32 = arith.constant 0 : i32
    %c0_i32_0 = arith.constant 0 : i32
    return %c0_i32, %arg0 : i32, i32
  }
}

module attributes {stable_mosaic.version = 11 : i64} {
  func.func @_conv_pool_kernel(%arg0: i32, %arg1: memref<16x150xf32, #tpu.memory_space<vmem>>, %arg2: memref<16x1xf32, #tpu.memory_space<vmem>>, %arg3: memref<4x150x128xf32, #tpu.memory_space<vmem>>, %arg4: memref<16x128xf32, #tpu.memory_space<vmem>>) attributes {dimension_semantics = [#tpu.dimension_semantics<parallel>], iteration_bounds = array<i64: 1>, scalar_prefetch = 0 : i64, scratch_operands = 0 : i64, tpu.core_type = #tpu.core_type<tc>, window_params = [{pipeline_mode = #tpu.pipeline_mode<synchronous>, transform_indices = @transform_0, window_bounds = array<i64: 16, 150>}, {pipeline_mode = #tpu.pipeline_mode<synchronous>, transform_indices = @transform_1, window_bounds = array<i64: 16, 1>}, {transform_indices = @transform_2, window_bounds = array<i64: 4, 150, 128>}, {transform_indices = @transform_3, window_bounds = array<i64: 16, 128>}]} {
    %c0 = arith.constant 0 : index
    %c0_0 = arith.constant 0 : index
    %0 = vector.load %arg1[%c0, %c0_0] : memref<16x150xf32, #tpu.memory_space<vmem>>, vector<16x150xf32>
    %c0_1 = arith.constant 0 : index
    %c0_2 = arith.constant 0 : index
    %c0_3 = arith.constant 0 : index
    %1 = vector.load %arg3[%c0_1, %c0_2, %c0_3] : memref<4x150x128xf32, #tpu.memory_space<vmem>>, vector<1x150x128xf32>
    %2 = vector.shape_cast %1 : vector<1x150x128xf32> to vector<150x128xf32>
    %cst = arith.constant dense<0.000000e+00> : vector<16x128xf32>
    %3 = tpu.matmul %0, %2, %cst {dimension_numbers = #tpu.dot_dimension_numbers<[1], [0], [0], [1], [0, 0, 1, 1], [], []>} : vector<16x150xf32>, vector<150x128xf32>, vector<16x128xf32> -> vector<16x128xf32>
    %c0_4 = arith.constant 0 : index
    %c0_5 = arith.constant 0 : index
    %4 = vector.load %arg1[%c0_4, %c0_5] : memref<16x150xf32, #tpu.memory_space<vmem>>, vector<16x150xf32>
    %c1 = arith.constant 1 : index
    %c0_6 = arith.constant 0 : index
    %c0_7 = arith.constant 0 : index
    %5 = vector.load %arg3[%c1, %c0_6, %c0_7] : memref<4x150x128xf32, #tpu.memory_space<vmem>>, vector<1x150x128xf32>
    %6 = vector.shape_cast %5 : vector<1x150x128xf32> to vector<150x128xf32>
    %cst_8 = arith.constant dense<0.000000e+00> : vector<16x128xf32>
    %7 = tpu.matmul %4, %6, %cst_8 {dimension_numbers = #tpu.dot_dimension_numbers<[1], [0], [0], [1], [0, 0, 1, 1], [], []>} : vector<16x150xf32>, vector<150x128xf32>, vector<16x128xf32> -> vector<16x128xf32>
    %8 = arith.maximumf %3, %7 : vector<16x128xf32>
    %c0_9 = arith.constant 0 : index
    %c0_10 = arith.constant 0 : index
    %9 = vector.load %arg1[%c0_9, %c0_10] : memref<16x150xf32, #tpu.memory_space<vmem>>, vector<16x150xf32>
    %c2 = arith.constant 2 : index
    %c0_11 = arith.constant 0 : index
    %c0_12 = arith.constant 0 : index
    %10 = vector.load %arg3[%c2, %c0_11, %c0_12] : memref<4x150x128xf32, #tpu.memory_space<vmem>>, vector<1x150x128xf32>
    %11 = vector.shape_cast %10 : vector<1x150x128xf32> to vector<150x128xf32>
    %cst_13 = arith.constant dense<0.000000e+00> : vector<16x128xf32>
    %12 = tpu.matmul %9, %11, %cst_13 {dimension_numbers = #tpu.dot_dimension_numbers<[1], [0], [0], [1], [0, 0, 1, 1], [], []>} : vector<16x150xf32>, vector<150x128xf32>, vector<16x128xf32> -> vector<16x128xf32>
    %13 = arith.maximumf %8, %12 : vector<16x128xf32>
    %c0_14 = arith.constant 0 : index
    %c0_15 = arith.constant 0 : index
    %14 = vector.load %arg1[%c0_14, %c0_15] : memref<16x150xf32, #tpu.memory_space<vmem>>, vector<16x150xf32>
    %c3 = arith.constant 3 : index
    %c0_16 = arith.constant 0 : index
    %c0_17 = arith.constant 0 : index
    %15 = vector.load %arg3[%c3, %c0_16, %c0_17] : memref<4x150x128xf32, #tpu.memory_space<vmem>>, vector<1x150x128xf32>
    %16 = vector.shape_cast %15 : vector<1x150x128xf32> to vector<150x128xf32>
    %cst_18 = arith.constant dense<0.000000e+00> : vector<16x128xf32>
    %17 = tpu.matmul %14, %16, %cst_18 {dimension_numbers = #tpu.dot_dimension_numbers<[1], [0], [0], [1], [0, 0, 1, 1], [], []>} : vector<16x150xf32>, vector<150x128xf32>, vector<16x128xf32> -> vector<16x128xf32>
    %18 = arith.maximumf %13, %17 : vector<16x128xf32>
    %c0_19 = arith.constant 0 : index
    %c0_20 = arith.constant 0 : index
    %19 = vector.load %arg2[%c0_19, %c0_20] : memref<16x1xf32, #tpu.memory_space<vmem>>, vector<16x1xf32>
    %20 = vector.broadcast %19 : vector<16x1xf32> to vector<16x128xf32>
    %21 = arith.addf %18, %20 : vector<16x128xf32>
    %cst_21 = arith.constant 0.000000e+00 : f32
    %22 = vector.broadcast %cst_21 : f32 to vector<16x128xf32>
    %23 = arith.maximumf %21, %22 : vector<16x128xf32>
    %c0_22 = arith.constant 0 : index
    %c0_23 = arith.constant 0 : index
    %24 = vector.load %arg4[%c0_22, %c0_23] : memref<16x128xf32, #tpu.memory_space<vmem>>, vector<16x128xf32>
    tpu.vector_store %arg4[%c0_22, %c0_23], %23 {strides = array<i32>} : memref<16x128xf32, #tpu.memory_space<vmem>>, vector<16x128xf32>,
    return
  }
  func.func @transform_0(%arg0: i32) -> (i32, i32) {
    %c0_i32 = arith.constant 0 : i32
    %c0_i32_0 = arith.constant 0 : i32
    %c0_i32_1 = arith.constant 0 : i32
    return %c0_i32, %c0_i32_0 : i32, i32
  }
  func.func @transform_1(%arg0: i32) -> (i32, i32) {
    %c0_i32 = arith.constant 0 : i32
    %c0_i32_0 = arith.constant 0 : i32
    %c0_i32_1 = arith.constant 0 : i32
    return %c0_i32, %c0_i32_0 : i32, i32
  }
  func.func @transform_2(%arg0: i32) -> (i32, i32, i32) {
    %c0_i32 = arith.constant 0 : i32
    %c0_i32_0 = arith.constant 0 : i32
    %c0_i32_1 = arith.constant 0 : i32
    return %c0_i32, %c0_i32_0, %arg0 : i32, i32, i32
  }
  func.func @transform_3(%arg0: i32) -> (i32, i32) {
    %c0_i32 = arith.constant 0 : i32
    %c0_i32_0 = arith.constant 0 : i32
    return %c0_i32, %arg0 : i32, i32
  }
}

module attributes {stable_mosaic.version = 11 : i64} {
  func.func @_fc_fused_kernel(%arg0: memref<2x400xf32, #tpu.memory_space<vmem>>, %arg1: memref<400x128xf32, #tpu.memory_space<vmem>>, %arg2: memref<1x128xf32, #tpu.memory_space<vmem>>, %arg3: memref<128x128xf32, #tpu.memory_space<vmem>>, %arg4: memref<1x128xf32, #tpu.memory_space<vmem>>, %arg5: memref<128x128xf32, #tpu.memory_space<vmem>>, %arg6: memref<1x128xf32, #tpu.memory_space<vmem>>, %arg7: memref<2x128xf32, #tpu.memory_space<vmem>>) attributes {dimension_semantics = [], scalar_prefetch = 0 : i64, scratch_operands = 0 : i64, tpu.core_type = #tpu.core_type<tc>} {
    %c0 = arith.constant 0 : index
    %c0_0 = arith.constant 0 : index
    %0 = vector.load %arg0[%c0, %c0_0] : memref<2x400xf32, #tpu.memory_space<vmem>>, vector<2x400xf32>
    %c0_1 = arith.constant 0 : index
    %c0_2 = arith.constant 0 : index
    %1 = vector.load %arg1[%c0_1, %c0_2] : memref<400x128xf32, #tpu.memory_space<vmem>>, vector<400x128xf32>
    %cst = arith.constant dense<0.000000e+00> : vector<2x128xf32>
    %2 = tpu.matmul %0, %1, %cst {dimension_numbers = #tpu.dot_dimension_numbers<[1], [0], [0], [1], [0, 0, 1, 1], [], []>} : vector<2x400xf32>, vector<400x128xf32>, vector<2x128xf32> -> vector<2x128xf32>
    %c0_3 = arith.constant 0 : index
    %c0_4 = arith.constant 0 : index
    %3 = vector.load %arg2[%c0_3, %c0_4] : memref<1x128xf32, #tpu.memory_space<vmem>>, vector<1x128xf32>
    %4 = vector.broadcast %3 : vector<1x128xf32> to vector<2x128xf32>
    %5 = arith.addf %2, %4 : vector<2x128xf32>
    %cst_5 = arith.constant 0.000000e+00 : f32
    %6 = vector.broadcast %cst_5 : f32 to vector<2x128xf32>
    %7 = arith.maximumf %5, %6 : vector<2x128xf32>
    %c0_6 = arith.constant 0 : index
    %c0_7 = arith.constant 0 : index
    %8 = vector.load %arg3[%c0_6, %c0_7] : memref<128x128xf32, #tpu.memory_space<vmem>>, vector<128x128xf32>
    %cst_8 = arith.constant dense<0.000000e+00> : vector<2x128xf32>
    %9 = tpu.matmul %7, %8, %cst_8 {dimension_numbers = #tpu.dot_dimension_numbers<[1], [0], [0], [1], [0, 0, 1, 1], [], []>} : vector<2x128xf32>, vector<128x128xf32>, vector<2x128xf32> -> vector<2x128xf32>
    %c0_9 = arith.constant 0 : index
    %c0_10 = arith.constant 0 : index
    %10 = vector.load %arg4[%c0_9, %c0_10] : memref<1x128xf32, #tpu.memory_space<vmem>>, vector<1x128xf32>
    %11 = vector.broadcast %10 : vector<1x128xf32> to vector<2x128xf32>
    %12 = arith.addf %9, %11 : vector<2x128xf32>
    %cst_11 = arith.constant 0.000000e+00 : f32
    %13 = vector.broadcast %cst_11 : f32 to vector<2x128xf32>
    %14 = arith.maximumf %12, %13 : vector<2x128xf32>
    %c0_12 = arith.constant 0 : index
    %c0_13 = arith.constant 0 : index
    %15 = vector.load %arg5[%c0_12, %c0_13] : memref<128x128xf32, #tpu.memory_space<vmem>>, vector<128x128xf32>
    %cst_14 = arith.constant dense<0.000000e+00> : vector<2x128xf32>
    %16 = tpu.matmul %14, %15, %cst_14 {dimension_numbers = #tpu.dot_dimension_numbers<[1], [0], [0], [1], [0, 0, 1, 1], [], []>} : vector<2x128xf32>, vector<128x128xf32>, vector<2x128xf32> -> vector<2x128xf32>
    %c0_15 = arith.constant 0 : index
    %c0_16 = arith.constant 0 : index
    %17 = vector.load %arg6[%c0_15, %c0_16] : memref<1x128xf32, #tpu.memory_space<vmem>>, vector<1x128xf32>
    %18 = vector.broadcast %17 : vector<1x128xf32> to vector<2x128xf32>
    %19 = arith.addf %16, %18 : vector<2x128xf32>
    %c0_17 = arith.constant 0 : index
    %c0_18 = arith.constant 0 : index
    %20 = vector.load %arg7[%c0_17, %c0_18] : memref<2x128xf32, #tpu.memory_space<vmem>>, vector<2x128xf32>
    tpu.vector_store %arg7[%c0_17, %c0_18], %19 {strides = array<i32>} : memref<2x128xf32, #tpu.memory_space<vmem>>, vector<2x128xf32>,
    return
  }
}

</mosaic_0001>

<bundles_post_ra>
// kernel: simple_network_forward.3
= control target key start
LH: loop header
LB: loop body
LE: loop exit
PB: predicated region body
PF: predicated region fallthrough
CT: control target
= control target key end

     0   :  { %v1157_v3 = vmov 0.0   ;;  %v1158_v8 = vmov 0   ;;  %vm59_vm0 = vcmask 1042432   ;;  %vm1159_vm1 = vmmov 1   ;;  %s1740_s2 = inlined_call_operand.vmem [shape: f32[4,75,512], index: 2, kind: input, shape index: {}]   ;;  %s1741_s0 = inlined_call_operand.vmem [shape: f32[6,75], index: 0, kind: input, shape index: {}]   ;;  %s1742_s1 = inlined_call_operand.vmem [shape: f32[6,1], index: 1, kind: input, shape index: {}]   ;;  %s1743_s3 = inlined_call_operand.vmem [shape: f32[6,512], index: 3, kind: output, shape index: {}]  }
   0x1   :  { %v16_v0 = vld [vmem:[%s1740_s2 + $0x8] sm:$0xff]  ;;  %v18_v2 = vld [vmem:[%s1740_s2 + $0x18] sm:$0xff]  ;;  %136 = vmatprep.mubr.f32.mxu0 %v1157_v3  ;;  %207 = vmatprep.mubr.f32.mxu1 %v1157_v3  ;;  %v15_v6 = vld [vmem:[%s1740_s2] sm:$0xff]  ;;  %vm55_vm3 = vcmask 613376  }
   0x2   :  { %v20_v1 = vld [vmem:[%s1740_s2 + $0x28] sm:$0xff]  ;;  %v22_v5 = vld [vmem:[%s1740_s2 + $0x38] sm:$0xff]  ;;  %v19_v7 = vld [vmem:[%s1740_s2 + $0x20] sm:$0xff]  ;;  %1156 = vset.pattern.permute.xlu0 %v1158_v8 }
   0x3   :  { %v977_v4 = vpack.c.bf16 %v20_v1, %v16_v0  ;;  %v999_v9 = vpack.c.bf16 %v22_v5, %v18_v2  ;;  %v979_v10 = vpack.c.bf16 %v19_v7, %v15_v6  ;;  %v17_v11 = vld [vmem:[%s1740_s2 + $0x10] sm:$0xff]  ;;  %v24_v13 = vld [vmem:[%s1740_s2 + $0x48] sm:$0xff]  ;;  %v26_v16 = vld [vmem:[%s1740_s2 + $0x58] sm:$0xff] }
   0x4   :  { %v21_v12 = vld [vmem:[%s1740_s2 + $0x30] sm:$0xff]  ;;  %v28_v15 = vld [vmem:[%s1740_s2 + $0x68] sm:$0xff]  ;;  %v30_v17 = vld [vmem:[%s1740_s2 + $0x78] sm:$0xff] }
   0x5   :  { %978 = vmatprep.subr.bf16.mxu0 %v977_v4  ;;  %v1001_v14 = vpack.c.bf16 %v21_v12, %v17_v11  ;;  %1000 = vmatprep.subr.bf16.mxu1 %v999_v9  ;;  %v981_v18 = vpack.c.bf16 %v28_v15, %v24_v13  ;;  %v1003_v19 = vpack.c.bf16 %v30_v17, %v26_v16  ;;  %v23_v20 = vld [vmem:[%s1740_s2 + $0x40] sm:$0xff]  ;;  %v25_v22 = vld [vmem:[%s1740_s2 + $0x50] sm:$0xff]  ;;  %v32_v25 = vld [vmem:[%s1740_s2 + $0x88] sm:$0xff] }
   0x6   :  { %980 = vmatpush1.bf16.msra.mxu0 %v979_v10  ;;  %v27_v21 = vld [vmem:[%s1740_s2 + $0x60] sm:$0xff]  ;;  %v29_v24 = vld [vmem:[%s1740_s2 + $0x70] sm:$0xff]  ;;  %v36_v26 = vld [vmem:[%s1740_s2 + $0xa8] sm:$0xff] }
   0x7   :  { %1002 = vmatpush1.bf16.msra.mxu1 %v1001_v14  ;;  %v983_v23 = vpack.c.bf16 %v27_v21, %v23_v20  ;;  %982 = vmatprep.subr.bf16.mxu0 %v981_v18  ;;  %v1005_v27 = vpack.c.bf16 %v29_v24, %v25_v22  ;;  %v985_v28 = vpack.c.bf16 %v36_v26, %v32_v25  ;;  %v34_v29 = vld [vmem:[%s1740_s2 + $0x98] sm:$0xff]  ;;  %v31_v31 = vld [vmem:[%s1740_s2 + $0x80] sm:$0xff]  ;;  %v33_v34 = vld [vmem:[%s1740_s2 + $0x90] sm:$0xff] }
   0x8   :  { %1004 = vmatprep.subr.bf16.mxu1 %v1003_v19  ;;  %v38_v30 = vld [vmem:[%s1740_s2 + $0xb8] sm:$0xff]  ;;  %v35_v33 = vld [vmem:[%s1740_s2 + $0xa0] sm:$0xff]  ;;  %v37_v35 = vld [vmem:[%s1740_s2 + $0xb0] sm:$0xff] }
   0x9   :  { %v1007_v32 = vpack.c.bf16 %v38_v30, %v34_v29  ;;  %v987_v36 = vpack.c.bf16 %v35_v33, %v31_v31  ;;  %v40_v37 = vld [vmem:[%s1740_s2 + $0xc8] sm:$0xff]  ;;  %v42_v39 = vld [vmem:[%s1740_s2 + $0xd8] sm:$0xff]  ;;  %v1009_v40 = vpack.c.bf16 %v37_v35, %v33_v34  ;;  %v39_v43 = vld [vmem:[%s1740_s2 + $0xc0] sm:$0xff] }
   0xa   :  { %984 = vmatpush1.bf16.msra.mxu0 %v983_v23  ;;  %v44_v38 = vld [vmem:[%s1740_s2 + $0xe8] sm:$0xff]  ;;  %v46_v42 = vld [vmem:[%s1740_s2 + $0xf8] sm:$0xff]  ;;  %v43_v44 = vld [vmem:[%s1740_s2 + $0xe0] sm:$0xff] }
   0xb   :  { %1006 = vmatpush1.bf16.msra.mxu1 %v1005_v27  ;;  %986 = vmatprep.subr.bf16.mxu0 %v985_v28  ;;  %v989_v41 = vpack.c.bf16 %v44_v38, %v40_v37  ;;  %v1011_v45 = vpack.c.bf16 %v46_v42, %v42_v39  ;;  %v41_v46 = vld [vmem:[%s1740_s2 + $0xd0] sm:$0xff]  ;;  %v48_v48 = vld [vmem:[%s1740_s2 + $0x108] sm:$0xff]  ;;  %v50_v50 = vld [vmem:[%s1740_s2 + $0x118] sm:$0xff]  ;;  %v991_v51 = vpack.c.bf16 %v43_v44, %v39_v43 }
   0xc   :  { %1008 = vmatprep.subr.bf16.mxu1 %v1007_v32  ;;  %v45_v47 = vld [vmem:[%s1740_s2 + $0xf0] sm:$0xff]  ;;  %v52_v49 = vld [vmem:[%s1740_s2 + $0x128] sm:$0x7]  ;;  %vm1287_vm2 = vmpackc.low %vm59_vm0, %vm1159_vm1 }
   0xd   :  { %v54_v53 = vld [vmem:[%s1740_s2 + $0x138] sm:$0x7]  ;;  %v1013_v54 = vpack.c.bf16 %v45_v47, %v41_v46  ;;  %v993_v55 = vpack.c.bf16 %v52_v49, %v48_v48  ;;  %v47_v56 = vld [vmem:[%s1740_s2 + $0x100] sm:$0xff]  ;;  %v49_v58 = vld [vmem:[%s1740_s2 + $0x110] sm:$0xff] }
   0xe   :  { %988 = vmatpush1.bf16.msra.mxu0 %v987_v36  ;;  %v51_v57 = vld [vmem:[%s1740_s2 + $0x120] sm:$0x7]  ;;  %v1015_v59 = vpack.c.bf16 %v54_v53, %v50_v50  ;;  %v53_v60 = vld [vmem:[%s1740_s2 + $0x130] sm:$0x7]  ;;  %v840_v61 = vld [vmem:[%s1740_s2 + $0x148] sm:$0xff] }
   0xf   :  { %1010 = vmatpush1.bf16.msra.mxu1 %v1009_v40  ;;  %990 = vmatprep.subr.bf16.mxu0 %v989_v41  ;;  %v844_v62 = vld [vmem:[%s1740_s2 + $0x168] sm:$0xff]  ;;  %v842_v63 = vld [vmem:[%s1740_s2 + $0x158] sm:$0xff]  ;;  %v996_v1 = vpack.c.bf16 %v51_v57, %v47_v56  ;;  %v1018_v2 = vpack.c.bf16 %v53_v60, %v49_v58  ;;  %v839_v5 = vld [vmem:[%s1740_s2 + $0x140] sm:$0xff] }
  0x10   :  { %1012 = vmatprep.subr.bf16.mxu1 %v1011_v45  ;;  %v846_v0 = vld [vmem:[%s1740_s2 + $0x178] sm:$0xff]  ;;  %v1021_v4 = vpack.c.bf16 %v844_v62, %v840_v61  ;;  %v843_v6 = vld [vmem:[%s1740_s2 + $0x160] sm:$0xff]  ;;  %v841_v7 = vld [vmem:[%s1740_s2 + $0x150] sm:$0xff] }
  0x11   :  { %v1043_v8 = vpack.c.bf16 %v846_v0, %v842_v63  ;;  %v845_v9 = vld [vmem:[%s1740_s2 + $0x170] sm:$0xff]  ;;  %v848_v10 = vld [vmem:[%s1740_s2 + $0x188] sm:$0xff]  ;;  %v850_v12 = vld [vmem:[%s1740_s2 + $0x198] sm:$0xff]  ;;  %v1023_v15 = vpack.c.bf16 %v843_v6, %v839_v5 }
  0x12   :  { %992 = vmatpush1.bf16.msra.mxu0 %v991_v51  ;;  %v852_v11 = vld [vmem:[%s1740_s2 + $0x1a8] sm:$0xff]  ;;  %v854_v13 = vld [vmem:[%s1740_s2 + $0x1b8] sm:$0xff]  ;;  %v1351_v14 = vld [vmem:[%s1741_s0] sm:$0x3f]  ;;  %v1045_v16 = vpack.c.bf16 %v845_v9, %v841_v7 }
  0x13   :  { %1014 = vmatpush1.bf16.msra.mxu1 %v1013_v54  ;;  %995 = vmatprep.subr.msk.bf16.mxu0 %vm1287_vm2, %v993_v55  ;;  %v1025_v17 = vpack.c.bf16 %v852_v11, %v848_v10  ;;  %v847_v18 = vld [vmem:[%s1740_s2 + $0x180] sm:$0xff]  ;;  %v849_v20 = vld [vmem:[%s1740_s2 + $0x190] sm:$0xff]  ;;  %v1047_v21 = vpack.c.bf16 %v854_v13, %v850_v12  ;;  %v856_v23 = vld [vmem:[%s1740_s2 + $0x1c8] sm:$0xff] }
  0x14   :  { %1017 = vmatprep.subr.msk.bf16.mxu1 %vm1287_vm2, %v1015_v59  ;;  %v851_v19 = vld [vmem:[%s1740_s2 + $0x1a0] sm:$0xff]  ;;  %v853_v22 = vld [vmem:[%s1740_s2 + $0x1b0] sm:$0xff]  ;;  %v860_v24 = vld [vmem:[%s1740_s2 + $0x1e8] sm:$0xff] }
  0x15   :  { %v858_v25 = vld [vmem:[%s1740_s2 + $0x1d8] sm:$0xff]  ;;  %v1027_v27 = vpack.c.bf16 %v851_v19, %v847_v18  ;;  %v1049_v28 = vpack.c.bf16 %v853_v22, %v849_v20  ;;  %v1029_v29 = vpack.c.bf16 %v860_v24, %v856_v23  ;;  %v855_v30 = vld [vmem:[%s1740_s2 + $0x1c0] sm:$0xff]  ;;  %v857_v32 = vld [vmem:[%s1740_s2 + $0x1d0] sm:$0xff] }
  0x16   :  { %998 = vmatpush1.bf16.msk.msra.mxu0 %vm1287_vm2, %v996_v1  ;;  %v862_v26 = vld [vmem:[%s1740_s2 + $0x1f8] sm:$0xff]  ;;  %v859_v31 = vld [vmem:[%s1740_s2 + $0x1e0] sm:$0xff]  ;;  %v861_v34 = vld [vmem:[%s1740_s2 + $0x1f0] sm:$0xff] }
  0x17   :  { %1020 = vmatpush1.bf16.msk.msra.mxu1 %vm1287_vm2, %v1018_v2  ;;  %1022 = vmatprep.subr.bf16.mxu0 %v1021_v4  ;;  %v1051_v33 = vpack.c.bf16 %v862_v26, %v858_v25  ;;  %v864_v35 = vld [vmem:[%s1740_s2 + $0x208] sm:$0xff]  ;;  %v866_v37 = vld [vmem:[%s1740_s2 + $0x218] sm:$0xff]  ;;  %v1031_v39 = vpack.c.bf16 %v859_v31, %v855_v30  ;;  %v1053_v40 = vpack.c.bf16 %v861_v34, %v857_v32  ;;  %v863_v42 = vld [vmem:[%s1740_s2 + $0x200] sm:$0xff] }
  0x18   :  { %1044 = vmatprep.subr.bf16.mxu1 %v1043_v8  ;;  %v868_v36 = vld [vmem:[%s1740_s2 + $0x228] sm:$0xff]  ;;  %v870_v38 = vld [vmem:[%s1740_s2 + $0x238] sm:$0xff]  ;;  %v867_v43 = vld [vmem:[%s1740_s2 + $0x220] sm:$0xff] }
  0x19   :  { %835 = vmatmul.mubr.msk.f32.vlgmr.msra.gmra.mrb[0].mxu0 %vm55_vm3, %v1351_v14  ;;  %v1033_v41 = vpack.c.bf16 %v868_v36, %v864_v35  ;;  %v865_v44 = vld [vmem:[%s1740_s2 + $0x210] sm:$0xff]  ;;  %v1055_v45 = vpack.c.bf16 %v870_v38, %v866_v37  ;;  %v872_v47 = vld [vmem:[%s1740_s2 + $0x248] sm:$0xff]  ;;  %v874_v49 = vld [vmem:[%s1740_s2 + $0x258] sm:$0xff]  ;;  %v1035_v51 = vpack.c.bf16 %v867_v43, %v863_v42 }
  0x1a   :  { %838 = vmatmul.mubr.msk.f32.vlgmr.msra.gmra.mrb[0].mxu1 %vm55_vm3, %v1351_v14  ;;  %1024 = vmatpush1.bf16.msra.mxu0 %v1023_v15  ;;  %v869_v46 = vld [vmem:[%s1740_s2 + $0x230] sm:$0xff]  ;;  %v876_v48 = vld [vmem:[%s1740_s2 + $0x268] sm:$0x7]  ;;  %v878_v50 = vld [vmem:[%s1740_s2 + $0x278] sm:$0x7] }
  0x1b   :  { %1046 = vmatpush1.bf16.msra.mxu1 %v1045_v16  ;;  %1026 = vmatprep.subr.bf16.mxu0 %v1025_v17  ;;  %v1057_v53 = vpack.c.bf16 %v869_v46, %v865_v44  ;;  %v1037_v54 = vpack.c.bf16 %v876_v48, %v872_v47  ;;  %v871_v55 = vld [vmem:[%s1740_s2 + $0x240] sm:$0xff]  ;;  %v873_v57 = vld [vmem:[%s1740_s2 + $0x250] sm:$0xff]  ;;  %v1059_v58 = vpack.c.bf16 %v878_v50, %v874_v49  ;;  %v886_v60 = vld [vmem:[%s1740_s2 + $0x288] sm:$0xff] }
  0x1c   :  { %1048 = vmatprep.subr.bf16.mxu1 %v1047_v21  ;;  %331 = vmatprep.mubr.f32.mxu0 %v1157_v3  ;;  %v875_v56 = vld [vmem:[%s1740_s2 + $0x260] sm:$0x7]  ;;  %v877_v59 = vld [vmem:[%s1740_s2 + $0x270] sm:$0x7]  ;;  %v890_v61 = vld [vmem:[%s1740_s2 + $0x2a8] sm:$0xff] }
  0x1d   :  { %402 = vmatprep.mubr.f32.mxu1 %v1157_v3  ;;  %v888_v62 = vld [vmem:[%s1740_s2 + $0x298] sm:$0xff]  ;;  %v1040_v0 = vpack.c.bf16 %v875_v56, %v871_v55  ;;  %v1062_v1 = vpack.c.bf16 %v877_v59, %v873_v57  ;;  %v1065_v2 = vpack.c.bf16 %v890_v61, %v886_v60  ;;  %v885_v4 = vld [vmem:[%s1740_s2 + $0x280] sm:$0xff]  ;;  %v887_v6 = vld [vmem:[%s1740_s2 + $0x290] sm:$0xff] }
  0x1e   :  { %1028 = vmatpush1.bf16.msra.mxu0 %v1027_v27  ;;  %v892_v63 = vld [vmem:[%s1740_s2 + $0x2b8] sm:$0xff]  ;;  %v889_v5 = vld [vmem:[%s1740_s2 + $0x2a0] sm:$0xff]  ;;  %v891_v8 = vld [vmem:[%s1740_s2 + $0x2b0] sm:$0xff] }
  0x1f   :  { %1050 = vmatpush1.bf16.msra.mxu1 %v1049_v28  ;;  %1030 = vmatprep.subr.bf16.mxu0 %v1029_v29  ;;  %v1087_v7 = vpack.c.bf16 %v892_v63, %v888_v62  ;;  %v894_v9 = vld [vmem:[%s1740_s2 + $0x2c8] sm:$0xff]  ;;  %v896_v11 = vld [vmem:[%s1740_s2 + $0x2d8] sm:$0xff]  ;;  %v1067_v13 = vpack.c.bf16 %v889_v5, %v885_v4  ;;  %v1089_v15 = vpack.c.bf16 %v891_v8, %v887_v6  ;;  %v893_v17 = vld [vmem:[%s1740_s2 + $0x2c0] sm:$0xff] }
  0x20   :  { %1052 = vmatprep.subr.bf16.mxu1 %v1051_v33  ;;  %v898_v10 = vld [vmem:[%s1740_s2 + $0x2e8] sm:$0xff]  ;;  %v900_v12 = vld [vmem:[%s1740_s2 + $0x2f8] sm:$0xff]  ;;  %v897_v18 = vld [vmem:[%s1740_s2 + $0x2e0] sm:$0xff] }
  0x21   :  { %v1069_v16 = vpack.c.bf16 %v898_v10, %v894_v9  ;;  %v895_v19 = vld [vmem:[%s1740_s2 + $0x2d0] sm:$0xff]  ;;  %v1091_v20 = vpack.c.bf16 %v900_v12, %v896_v11  ;;  %v902_v22 = vld [vmem:[%s1740_s2 + $0x308] sm:$0xff]  ;;  %v904_v24 = vld [vmem:[%s1740_s2 + $0x318] sm:$0xff]  ;;  %v1071_v26 = vpack.c.bf16 %v897_v18, %v893_v17 }
  0x22   :  { %1032 = vmatpush1.bf16.msra.mxu0 %v1031_v39  ;;  %v899_v21 = vld [vmem:[%s1740_s2 + $0x2f0] sm:$0xff]  ;;  %v906_v23 = vld [vmem:[%s1740_s2 + $0x328] sm:$0xff]  ;;  %v908_v25 = vld [vmem:[%s1740_s2 + $0x338] sm:$0xff] }
  0x23   :  { %1054 = vmatpush1.bf16.msra.mxu1 %v1053_v40  ;;  %1034 = vmatprep.subr.bf16.mxu0 %v1033_v41  ;;  %v1093_v27 = vpack.c.bf16 %v899_v21, %v895_v19  ;;  %v1073_v28 = vpack.c.bf16 %v906_v23, %v902_v22  ;;  %v901_v29 = vld [vmem:[%s1740_s2 + $0x300] sm:$0xff]  ;;  %v903_v31 = vld [vmem:[%s1740_s2 + $0x310] sm:$0xff]  ;;  %v1095_v32 = vpack.c.bf16 %v908_v25, %v904_v24  ;;  %v910_v34 = vld [vmem:[%s1740_s2 + $0x348] sm:$0xff] }
  0x24   :  { %1056 = vmatprep.subr.bf16.mxu1 %v1055_v45  ;;  %v905_v30 = vld [vmem:[%s1740_s2 + $0x320] sm:$0xff]  ;;  %v907_v33 = vld [vmem:[%s1740_s2 + $0x330] sm:$0xff]  ;;  %v914_v35 = vld [vmem:[%s1740_s2 + $0x368] sm:$0xff] }
  0x25   :  { %v912_v36 = vld [vmem:[%s1740_s2 + $0x358] sm:$0xff]  ;;  %v1075_v38 = vpack.c.bf16 %v905_v30, %v901_v29  ;;  %v1097_v39 = vpack.c.bf16 %v907_v33, %v903_v31  ;;  %v1077_v40 = vpack.c.bf16 %v914_v35, %v910_v34  ;;  %v909_v41 = vld [vmem:[%s1740_s2 + $0x340] sm:$0xff]  ;;  %v911_v43 = vld [vmem:[%s1740_s2 + $0x350] sm:$0xff] }
  0x26   :  { %1036 = vmatpush1.bf16.msra.mxu0 %v1035_v51  ;;  %v916_v37 = vld [vmem:[%s1740_s2 + $0x378] sm:$0xff]  ;;  %v913_v42 = vld [vmem:[%s1740_s2 + $0x360] sm:$0xff]  ;;  %v915_v45 = vld [vmem:[%s1740_s2 + $0x370] sm:$0xff] }
  0x27   :  { %1058 = vmatpush1.bf16.msra.mxu1 %v1057_v53  ;;  %1039 = vmatprep.subr.msk.bf16.mxu0 %vm1287_vm2, %v1037_v54  ;;  %v1099_v44 = vpack.c.bf16 %v916_v37, %v912_v36  ;;  %v918_v46 = vld [vmem:[%s1740_s2 + $0x388] sm:$0xff]  ;;  %v920_v48 = vld [vmem:[%s1740_s2 + $0x398] sm:$0xff]  ;;  %v1079_v50 = vpack.c.bf16 %v913_v42, %v909_v41  ;;  %v917_v51 = vld [vmem:[%s1740_s2 + $0x380] sm:$0xff]  ;;  %v1101_v53 = vpack.c.bf16 %v915_v45, %v911_v43 }
  0x28   :  { %1061 = vmatprep.subr.msk.bf16.mxu1 %vm1287_vm2, %v1059_v58  ;;  %v922_v47 = vld [vmem:[%s1740_s2 + $0x3a8] sm:$0x7]  ;;  %v924_v49 = vld [vmem:[%s1740_s2 + $0x3b8] sm:$0x7]  ;;  %v921_v55 = vld [vmem:[%s1740_s2 + $0x3a0] sm:$0x7] }
  0x29   :  { %v1081_v54 = vpack.c.bf16 %v922_v47, %v918_v46  ;;  %v919_v56 = vld [vmem:[%s1740_s2 + $0x390] sm:$0xff]  ;;  %v1103_v58 = vpack.c.bf16 %v924_v49, %v920_v48  ;;  %v932_v59 = vld [vmem:[%s1740_s2 + $0x3c8] sm:$0xff]  ;;  %v811_v61 = vld [vmem:[%s1742_s1] sm:$0x3f] }
  0x2a   :  { %1042 = vmatpush1.bf16.msk.msra.mxu0 %vm1287_vm2, %v1040_v0  ;;  %v923_v57 = vld [vmem:[%s1740_s2 + $0x3b0] sm:$0x7]  ;;  %v936_v60 = vld [vmem:[%s1740_s2 + $0x3e8] sm:$0xff]  ;;  %v934_v62 = vld [vmem:[%s1740_s2 + $0x3d8] sm:$0xff]  ;;  %814 = vperm.xlu0 %1156, %v811_v61   ;;  %v1084_v0 = vpack.c.bf16 %v921_v55, %v917_v51 }
  0x2b   :  { %1064 = vmatpush1.bf16.msk.msra.mxu1 %vm1287_vm2, %v1062_v1  ;;  %1066 = vmatprep.subr.bf16.mxu0 %v1065_v2  ;;  %v938_v63 = vld [vmem:[%s1740_s2 + $0x3f8] sm:$0xff]  ;;  %v1106_v1 = vpack.c.bf16 %v923_v57, %v919_v56  ;;  %v1109_v2 = vpack.c.bf16 %v936_v60, %v932_v59  ;;  %v931_v4 = vld [vmem:[%s1740_s2 + $0x3c0] sm:$0xff]  ;;  %v933_v6 = vld [vmem:[%s1740_s2 + $0x3d0] sm:$0xff] }
  0x2c   :  { %1088 = vmatprep.subr.bf16.mxu1 %v1087_v7  ;;  %v935_v5 = vld [vmem:[%s1740_s2 + $0x3e0] sm:$0xff]  ;;  %v1131_v7 = vpack.c.bf16 %v938_v63, %v934_v62  ;;  %v937_v8 = vld [vmem:[%s1740_s2 + $0x3f0] sm:$0xff]  ;;  %v940_v9 = vld [vmem:[%s1740_s2 + $0x408] sm:$0xff] }
  0x2d   :  { %881 = vmatmul.mubr.msk.f32.vlgmr.msra.gmra.mrb[2].mxu0 %vm55_vm3, %v1351_v14  ;;  %v944_v10 = vld [vmem:[%s1740_s2 + $0x428] sm:$0xff]  ;;  %v942_v11 = vld [vmem:[%s1740_s2 + $0x418] sm:$0xff]  ;;  %v939_v17 = vld [vmem:[%s1740_s2 + $0x400] sm:$0xff] }
  0x2e   :  { %884 = vmatmul.mubr.msk.f32.vlgmr.msra.gmra.mrb[2].mxu1 %vm55_vm3, %v1351_v14  ;;  %1068 = vmatpush1.bf16.msra.mxu0 %v1067_v13  ;;  %v946_v12 = vld [vmem:[%s1740_s2 + $0x438] sm:$0xff]  ;;  %v1111_v13 = vpack.c.bf16 %v935_v5, %v931_v4  ;;  %v943_v18 = vld [vmem:[%s1740_s2 + $0x420] sm:$0xff]  ;;  %v941_v19 = vld [vmem:[%s1740_s2 + $0x410] sm:$0xff] }
  0x2f   :  { %1090 = vmatpush1.bf16.msra.mxu1 %v1089_v15  ;;  %1070 = vmatprep.subr.bf16.mxu0 %v1069_v16  ;;  %v1133_v15 = vpack.c.bf16 %v937_v8, %v933_v6  ;;  %v1113_v16 = vpack.c.bf16 %v944_v10, %v940_v9  ;;  %v945_v21 = vld [vmem:[%s1740_s2 + $0x430] sm:$0xff]  ;;  %v948_v22 = vld [vmem:[%s1740_s2 + $0x448] sm:$0xff]  ;;  %v950_v24 = vld [vmem:[%s1740_s2 + $0x458] sm:$0xff] }
  0x30   :  { %1092 = vmatprep.subr.bf16.mxu1 %v1091_v20  ;;  %530 = vmatprep.mubr.f32.mxu0 %v1157_v3  ;;  %v1135_v20 = vpack.c.bf16 %v946_v12, %v942_v11  ;;  %v952_v23 = vld [vmem:[%s1740_s2 + $0x468] sm:$0xff]  ;;  %v954_v25 = vld [vmem:[%s1740_s2 + $0x478] sm:$0xff]  ;;  %v947_v29 = vld [vmem:[%s1740_s2 + $0x440] sm:$0xff] }
  0x31   :  { %601 = vmatprep.mubr.f32.mxu1 %v1157_v3  ;;  %v951_v30 = vld [vmem:[%s1740_s2 + $0x460] sm:$0xff]  ;;  %v949_v31 = vld [vmem:[%s1740_s2 + $0x450] sm:$0xff]  ;;  %v956_v34 = vld [vmem:[%s1740_s2 + $0x488] sm:$0xff] }
  0x32   :  { %1072 = vmatpush1.bf16.msra.mxu0 %v1071_v26  ;;  %v1115_v26 = vpack.c.bf16 %v943_v18, %v939_v17  ;;  %v953_v33 = vld [vmem:[%s1740_s2 + $0x470] sm:$0xff]  ;;  %v960_v35 = vld [vmem:[%s1740_s2 + $0x4a8] sm:$0xff]  ;;  %v958_v36 = vld [vmem:[%s1740_s2 + $0x498] sm:$0xff] }
  0x33   :  { %1094 = vmatpush1.bf16.msra.mxu1 %v1093_v27  ;;  %1074 = vmatprep.subr.bf16.mxu0 %v1073_v28  ;;  %v1137_v27 = vpack.c.bf16 %v945_v21, %v941_v19  ;;  %v1117_v28 = vpack.c.bf16 %v952_v23, %v948_v22  ;;  %v962_v37 = vld [vmem:[%s1740_s2 + $0x4b8] sm:$0xff]  ;;  %v955_v41 = vld [vmem:[%s1740_s2 + $0x480] sm:$0xff]  ;;  %v957_v43 = vld [vmem:[%s1740_s2 + $0x490] sm:$0xff] }
  0x34   :  { %1096 = vmatprep.subr.bf16.mxu1 %v1095_v32  ;;  %v1139_v32 = vpack.c.bf16 %v954_v25, %v950_v24  ;;  %v959_v42 = vld [vmem:[%s1740_s2 + $0x4a0] sm:$0xff]  ;;  %v964_v45 = vld [vmem:[%s1740_s2 + $0x4c8] sm:$0xff]  ;;  %v966_v47 = vld [vmem:[%s1740_s2 + $0x4d8] sm:$0xff] }
  0x35   :  { %v968_v46 = vld [vmem:[%s1740_s2 + $0x4e8] sm:$0x7]  ;;  %v970_v48 = vld [vmem:[%s1740_s2 + $0x4f8] sm:$0x7]  ;;  %v1123_v49 = vpack.c.bf16 %v959_v42, %v955_v41  ;;  %v965_v56 = vld [vmem:[%s1740_s2 + $0x4d0] sm:$0xff] }
  0x36   :  { %1076 = vmatpush1.bf16.msra.mxu0 %v1075_v38  ;;  %v1119_v38 = vpack.c.bf16 %v951_v30, %v947_v29  ;;  %v1125_v51 = vpack.c.bf16 %v968_v46, %v964_v45  ;;  %v1147_v55 = vpack.c.bf16 %v970_v48, %v966_v47  ;;  %v969_v57 = vld [vmem:[%s1740_s2 + $0x4f0] sm:$0x7] }
  0x37   :  { %1098 = vmatpush1.bf16.msra.mxu1 %v1097_v39  ;;  %1078 = vmatprep.subr.bf16.mxu0 %v1077_v40  ;;  %v1141_v39 = vpack.c.bf16 %v953_v33, %v949_v31  ;;  %v1121_v40 = vpack.c.bf16 %v960_v35, %v956_v34  ;;  %v1150_v59 = vpack.c.bf16 %v969_v57, %v965_v56 }
  0x38   :  { %1100 = vmatprep.subr.bf16.mxu1 %v1099_v44  ;;  %v961_v44 = vld [vmem:[%s1740_s2 + $0x4b0] sm:$0xff] }
  0x3a   :  { %1080 = vmatpush1.bf16.msra.mxu0 %v1079_v50  ;;  %v1145_v50 = vpack.c.bf16 %v961_v44, %v957_v43 }
  0x3b   :  { %1102 = vmatpush1.bf16.msra.mxu1 %v1101_v53  ;;  %1083 = vmatprep.subr.msk.bf16.mxu0 %vm1287_vm2, %v1081_v54  ;;  %v963_v53 = vld [vmem:[%s1740_s2 + $0x4c0] sm:$0xff] }
  0x3c   :  { %1105 = vmatprep.subr.msk.bf16.mxu1 %vm1287_vm2, %v1103_v58  ;;  %v967_v54 = vld [vmem:[%s1740_s2 + $0x4e0] sm:$0x7] }
  0x3d   :  { %v1128_v58 = vpack.c.bf16 %v967_v54, %v963_v53 }
  0x3e   :  { %1086 = vmatpush1.bf16.msk.msra.mxu0 %vm1287_vm2, %v1084_v0 }
  0x3f   :  { %1108 = vmatpush1.bf16.msk.msra.mxu1 %vm1287_vm2, %v1106_v1  ;;  %1110 = vmatprep.subr.bf16.mxu0 %v1109_v2 }
  0x40   :  { %1132 = vmatprep.subr.bf16.mxu1 %v1131_v7 }
  0x41   :  { %927 = vmatmul.mubr.msk.f32.vlgmr.msra.gmra.mrb[4].mxu0 %vm55_vm3, %v1351_v14 }
  0x42   :  { %930 = vmatmul.mubr.msk.f32.vlgmr.msra.gmra.mrb[4].mxu1 %vm55_vm3, %v1351_v14  ;;  %1112 = vmatpush1.bf16.msra.mxu0 %v1111_v13 }
  0x43   :  { %1134 = vmatpush1.bf16.msra.mxu1 %v1133_v15  ;;  %1114 = vmatprep.subr.bf16.mxu0 %v1113_v16 }
  0x44   :  { %1136 = vmatprep.subr.bf16.mxu1 %v1135_v20  ;;  %729 = vmatprep.mubr.f32.mxu0 %v1157_v3 }
  0x45   :  { %800 = vmatprep.mubr.f32.mxu1 %v1157_v3  ;;  %v1143_v3 = vpack.c.bf16 %v962_v37, %v958_v36 }
  0x46   :  { %1116 = vmatpush1.bf16.msra.mxu0 %v1115_v26 }
  0x47   :  { %1138 = vmatpush1.bf16.msra.mxu1 %v1137_v27  ;;  %1118 = vmatprep.subr.bf16.mxu0 %v1117_v28 }
  0x48   :  { %1140 = vmatprep.subr.bf16.mxu1 %v1139_v32 }
  0x4a   :  { %1120 = vmatpush1.bf16.msra.mxu0 %v1119_v38 }
  0x4b   :  { %1142 = vmatpush1.bf16.msra.mxu1 %v1141_v39  ;;  %1122 = vmatprep.subr.bf16.mxu0 %v1121_v40 }
  0x4c   :  { %1144 = vmatprep.subr.bf16.mxu1 %v1143_v3 }
  0x4e   :  { %1124 = vmatpush1.bf16.msra.mxu0 %v1123_v49 }
  0x4f   :  { %1146 = vmatpush1.bf16.msra.mxu1 %v1145_v50  ;;  %1127 = vmatprep.subr.msk.bf16.mxu0 %vm1287_vm2, %v1125_v51 }
  0x50   :  { %1149 = vmatprep.subr.msk.bf16.mxu1 %vm1287_vm2, %v1147_v55 }
  0x52   :  { %1130 = vmatpush1.bf16.msk.msra.mxu0 %vm1287_vm2, %v1128_v58 }
  0x53   :  { %1152 = vmatpush1.bf16.msk.msra.mxu1 %vm1287_vm2, %v1150_v59 }
  0x55   :  { %973 = vmatmul.mubr.msk.f32.vlgmr.msra.gmra.mrb[6].mxu0 %vm55_vm3, %v1351_v14 }
  0x56   :  { %976 = vmatmul.mubr.msk.f32.vlgmr.msra.gmra.mrb[6].mxu1 %vm55_vm3, %v1351_v14 }
  0xa9   :  { %v815_v17 = vpop.permute.xlu0 %814 }
  0xec   :  { %v138_v60 = vpop.f32.mrb[0].mxu0 }
  0xed   :  { %v209_v61 = vpop.f32.mrb[0].mxu1  ;;  %v140_v62 = vpop.f32.mrb[1].mxu0 }
  0xee   :  { %v211_v63 = vpop.f32.mrb[1].mxu1 }
 0x100   :  { %v333_v0 = vpop.f32.mrb[2].mxu0 }
 0x101   :  { %v409_v1 = vmax.f32 %v138_v60, %v333_v0  ;;  %v404_v2 = vpop.f32.mrb[2].mxu1  ;;  %v335_v4 = vpop.f32.mrb[3].mxu0 }
 0x102   :  { %v411_v5 = vmax.f32 %v209_v61, %v404_v2  ;;  %v410_v6 = vmax.f32 %v140_v62, %v335_v4  ;;  %v406_v7 = vpop.f32.mrb[3].mxu1 }
 0x103   :  { %v412_v8 = vmax.f32 %v211_v63, %v406_v7 }
 0x114   :  { %v532_v52 = vpop.f32.mrb[4].mxu0 }
 0x115   :  { %v608_v9 = vmax.f32 %v409_v1, %v532_v52  ;;  %v603_v10 = vpop.f32.mrb[4].mxu1  ;;  %v534_v11 = vpop.f32.mrb[5].mxu0 }
 0x116   :  { %v610_v12 = vmax.f32 %v411_v5, %v603_v10  ;;  %v609_v13 = vmax.f32 %v410_v6, %v534_v11  ;;  %v605_v15 = vpop.f32.mrb[5].mxu1 }
 0x117   :  { %v611_v14 = vmax.f32 %v412_v8, %v605_v15 }
 0x128   :  { %v731_v16 = vpop.f32.mrb[6].mxu0 }
 0x129   :  { %v807_v18 = vmax.f32 %v608_v9, %v731_v16  ;;  %v802_v19 = vpop.f32.mrb[6].mxu1  ;;  %v733_v20 = vpop.f32.mrb[7].mxu0 }
 0x12a   :  { %v809_v21 = vmax.f32 %v610_v12, %v802_v19  ;;  %v808_v22 = vmax.f32 %v609_v13, %v733_v20  ;;  %v804_v23 = vpop.f32.mrb[7].mxu1 }
 0x12b   :  { %v810_v24 = vmax.f32 %v611_v14, %v804_v23  ;;  %v817_v25 = vadd.f32 %v815_v17, %v807_v18 }
 0x12c   :  { %v818_v26 = vadd.f32 %v815_v17, %v808_v22  ;;  %v819_v27 = vadd.f32 %v815_v17, %v809_v21 }
 0x12d   :  { %v820_v28 = vadd.f32 %v815_v17, %v810_v24  ;;  %v821_v29 = vmax.f32 %v817_v25, 0.0 }
 0x12e   :  { %v822_v30 = vmax.f32 %v818_v26, 0.0  ;;  %v823_v31 = vmax.f32 %v819_v27, 0.0 }
 0x12f   :  { %v824_v32 = vmax.f32 %v820_v28, 0.0  ;;  %825 = vst [vmem:[%s1743_s3] sm:$0x3f] %v821_v29 }
 0x130   :  { %826 = vst [vmem:[%s1743_s3 + $0x8] sm:$0x3f] %v822_v30  ;;  %827 = vst [vmem:[%s1743_s3 + $0x10] sm:$0x3f] %v823_v31 }
 0x131   :  { %828 = vst [vmem:[%s1743_s3 + $0x18] sm:$0x3f] %v824_v32 }

// kernel: simple_network_forward.4
= control target key start
LH: loop header
LB: loop body
LE: loop exit
PB: predicated region body
PF: predicated region fallthrough
CT: control target
= control target key end

     0   :  { %v626_v0 = vmov 0.0|0.0   ;;  %v627_v8 = vmov 0   ;;  %vm37_vm0 = vcmask 179200   ;;  %v628_v61 = vmov 0.0   ;;  %s977_s2 = inlined_call_operand.vmem [shape: f32[4,150,128], index: 2, kind: input, shape index: {}]   ;;  %s978_s0 = inlined_call_operand.vmem [shape: f32[16,150], index: 0, kind: input, shape index: {}]   ;;  %s979_s1 = inlined_call_operand.vmem [shape: f32[16,1], index: 1, kind: input, shape index: {}]   ;;  %s980_s3 = inlined_call_operand.vmem [shape: f32[16,128], index: 3, kind: output, shape index: {}]  }
   0x1   :  { %514 = vmatprep.subr.bf16.mxu0 %v626_v0  ;;  %v18_v1 = vld [vmem:[%s977_s2] sm:$0xff]  ;;  %v19_v2 = vld [vmem:[%s977_s2 + $0x8] sm:$0xff]  ;;  %541 = vmatprep.subr.bf16.mxu1 %v626_v0  ;;  %v448_v3 = vld [vmem:[%s977_s2 + $0x98] sm:$0xff]  ;;  %vm44_vm1 = vcmask 1045504  }
   0x2   :  { %v515_v4 = vpack.c.bf16 %v19_v2, %v18_v1  ;;  %v449_v5 = vld [vmem:[%s977_s2 + $0xa0] sm:$0xff]  ;;  %v20_v6 = vld [vmem:[%s977_s2 + $0x10] sm:$0xff]  ;;  %v21_v7 = vld [vmem:[%s977_s2 + $0x18] sm:$0xff]  ;;  %625 = vset.pattern.permute.xlu0 %v627_v8 }
   0x3   :  { %v542_v9 = vpack.c.bf16 %v449_v5, %v448_v3  ;;  %v450_v10 = vld [vmem:[%s977_s2 + $0xa8] sm:$0xff]  ;;  %v451_v11 = vld [vmem:[%s977_s2 + $0xb0] sm:$0xff]  ;;  %v518_v12 = vpack.c.bf16 %v21_v7, %v20_v6  ;;  %v22_v14 = vld [vmem:[%s977_s2 + $0x20] sm:$0xff] }
   0x4   :  { %516 = vmatpush1.bf16.msra.mxu0 %v515_v4  ;;  %v545_v13 = vpack.c.bf16 %v451_v11, %v450_v10  ;;  %v23_v15 = vld [vmem:[%s977_s2 + $0x28] sm:$0xff]  ;;  %v452_v16 = vld [vmem:[%s977_s2 + $0xb8] sm:$0xff]  ;;  %v453_v17 = vld [vmem:[%s977_s2 + $0xc0] sm:$0xff] }
   0x5   :  { %543 = vmatpush1.bf16.msra.mxu1 %v542_v9  ;;  %517 = vmatprep.subr.bf16.mxu0 %v626_v0  ;;  %v521_v18 = vpack.c.bf16 %v23_v15, %v22_v14  ;;  %v548_v19 = vpack.c.bf16 %v453_v17, %v452_v16  ;;  %v24_v20 = vld [vmem:[%s977_s2 + $0x30] sm:$0xff]  ;;  %v25_v21 = vld [vmem:[%s977_s2 + $0x38] sm:$0xff]  ;;  %v454_v22 = vld [vmem:[%s977_s2 + $0xc8] sm:$0xff] }
   0x6   :  { %544 = vmatprep.subr.bf16.mxu1 %v626_v0  ;;  %v455_v23 = vld [vmem:[%s977_s2 + $0xd0] sm:$0xff]  ;;  %v524_v24 = vpack.c.bf16 %v25_v21, %v24_v20  ;;  %v26_v26 = vld [vmem:[%s977_s2 + $0x40] sm:$0xff]  ;;  %v27_v27 = vld [vmem:[%s977_s2 + $0x48] sm:$0xff] }
   0x7   :  { %v551_v25 = vpack.c.bf16 %v455_v23, %v454_v22  ;;  %v713_v28 = vld [vmem:[%s978_s0 + $0x8] sm:$0xff]  ;;  %v456_v29 = vld [vmem:[%s977_s2 + $0xd8] sm:$0xff]  ;;  %v457_v30 = vld [vmem:[%s977_s2 + $0xe0] sm:$0xff]  ;;  %v527_v31 = vpack.c.bf16 %v27_v27, %v26_v26 }
   0x8   :  { %519 = vmatpush1.bf16.msra.mxu0 %v518_v12  ;;  %446 = vmatprep.mubr.msk.f32.mxu0 %vm37_vm0, %v713_v28  ;;  %v554_v32 = vpack.c.bf16 %v457_v30, %v456_v29  ;;  %v28_v33 = vld [vmem:[%s977_s2 + $0x50] sm:$0xff]  ;;  %v29_v34 = vld [vmem:[%s977_s2 + $0x58] sm:$0xff]  ;;  %v458_v35 = vld [vmem:[%s977_s2 + $0xe8] sm:$0xff] }
   0x9   :  { %546 = vmatpush1.bf16.msra.mxu1 %v545_v13  ;;  %520 = vmatprep.subr.bf16.mxu0 %v626_v0  ;;  %v459_v36 = vld [vmem:[%s977_s2 + $0xf0] sm:$0xff]  ;;  %v530_v37 = vpack.c.bf16 %v29_v34, %v28_v33  ;;  %v30_v39 = vld [vmem:[%s977_s2 + $0x60] sm:$0xff]  ;;  %v31_v40 = vld [vmem:[%s977_s2 + $0x68] sm:$0xff] }
   0xa   :  { %547 = vmatprep.subr.bf16.mxu1 %v626_v0  ;;  %468 = vmatprep.mubr.msk.f32.mxu1 %vm37_vm0, %v713_v28  ;;  %v557_v38 = vpack.c.bf16 %v459_v36, %v458_v35  ;;  %v460_v41 = vld [vmem:[%s977_s2 + $0xf8] sm:$0xff]  ;;  %v461_v42 = vld [vmem:[%s977_s2 + $0x100] sm:$0xff]  ;;  %v533_v43 = vpack.c.bf16 %v31_v40, %v30_v39  ;;  %v32_v45 = vld [vmem:[%s977_s2 + $0x70] sm:$0xff] }
   0xb   :  { %v560_v44 = vpack.c.bf16 %v461_v42, %v460_v41  ;;  %v33_v46 = vld [vmem:[%s977_s2 + $0x78] sm:$0xff]  ;;  %v462_v47 = vld [vmem:[%s977_s2 + $0x108] sm:$0xff]  ;;  %v463_v48 = vld [vmem:[%s977_s2 + $0x110] sm:$0xff] }
   0xc   :  { %522 = vmatpush1.bf16.msra.mxu0 %v521_v18  ;;  %v423_v49 = vld [vmem:[%s979_s1] sm:$0xff]  ;;  %v536_v50 = vpack.c.bf16 %v33_v46, %v32_v45  ;;  %v563_v51 = vpack.c.bf16 %v463_v48, %v462_v47  ;;  %v35_v53 = vld [vmem:[%s977_s2 + $0x88] sm:$0xff]  ;;  %v464_v55 = vld [vmem:[%s977_s2 + $0x118] sm:$0xff] }
   0xd   :  { %549 = vmatpush1.bf16.msra.mxu1 %v548_v19  ;;  %523 = vmatprep.subr.bf16.mxu0 %v626_v0  ;;  %v34_v52 = vld [vmem:[%s977_s2 + $0x80] sm:$0xff]  ;;  %v424_v54 = vld [vmem:[%s979_s1 + $0x8] sm:$0xff]  ;;  %v470_v59 = vld [vmem:[%s977_s2 + $0x130] sm:$0xff] }
   0xe   :  { %550 = vmatprep.subr.bf16.mxu1 %v626_v0  ;;  %427 = vperm.xlu0 %625, %v423_v49   ;;  %v465_v56 = vld [vmem:[%s977_s2 + $0x120] sm:$0xff]  ;;  %v539_v57 = vpack.c.bf16 %v35_v53, %v34_v52  ;;  %v471_v60 = vld [vmem:[%s977_s2 + $0x138] sm:$0xff]  ;;  %v36_v62 = vld [vmem:[%s977_s2 + $0x90] sm:$0x3f] }
   0xf   :  { %v566_v58 = vpack.c.bf16 %v465_v56, %v464_v55  ;;  %v492_v63 = vld [vmem:[%s977_s2 + $0x1c8] sm:$0xff]  ;;  %v493_v1 = vld [vmem:[%s977_s2 + $0x1d0] sm:$0xff]  ;;  %v810_v2 = vld [vmem:[%s978_s0] sm:$0xff]  ;;  %v569_v4 = vpack.c.bf16 %v471_v60, %v470_v59 }
  0x10   :  { %525 = vmatpush1.bf16.msra.mxu0 %v524_v24  ;;  %v466_v3 = vld [vmem:[%s977_s2 + $0x128] sm:$0x3f]  ;;  %v596_v5 = vpack.c.bf16 %v493_v1, %v492_v63  ;;  %v472_v6 = vld [vmem:[%s977_s2 + $0x140] sm:$0xff]  ;;  %v494_v8 = vld [vmem:[%s977_s2 + $0x1d8] sm:$0xff] }
  0x11   :  { %552 = vmatpush1.bf16.msra.mxu1 %v551_v25  ;;  %526 = vmatprep.subr.bf16.mxu0 %v626_v0  ;;  %v473_v7 = vld [vmem:[%s977_s2 + $0x148] sm:$0xff]  ;;  %v495_v9 = vld [vmem:[%s977_s2 + $0x1e0] sm:$0xff]  ;;  %v835_v10 = vld [vmem:[%s978_s0 + $0x18] sm:$0xff] }
  0x12   :  { %553 = vmatprep.subr.bf16.mxu1 %v626_v0  ;;  %432 = vperm.xlu0 %625, %v424_v54   ;;  %v572_v11 = vpack.c.bf16 %v473_v7, %v472_v6  ;;  %v841_v12 = vld [vmem:[%s978_s0 + $0x10] sm:$0xff]  ;;  %v599_v13 = vpack.c.bf16 %v495_v9, %v494_v8  ;;  %v475_v15 = vld [vmem:[%s977_s2 + $0x158] sm:$0xff]  ;;  %v496_v16 = vld [vmem:[%s977_s2 + $0x1e8] sm:$0xff] }
  0x13   :  { %v474_v14 = vld [vmem:[%s977_s2 + $0x150] sm:$0xff]  ;;  %v476_v20 = vld [vmem:[%s977_s2 + $0x160] sm:$0xff]  ;;  %v477_v21 = vld [vmem:[%s977_s2 + $0x168] sm:$0xff] }
  0x14   :  { %528 = vmatpush1.bf16.msra.mxu0 %v527_v31  ;;  %v497_v17 = vld [vmem:[%s977_s2 + $0x1f0] sm:$0xff]  ;;  %v575_v18 = vpack.c.bf16 %v475_v15, %v474_v14  ;;  %v498_v22 = vld [vmem:[%s977_s2 + $0x1f8] sm:$0xff]  ;;  %v499_v23 = vld [vmem:[%s977_s2 + $0x200] sm:$0xff]  ;;  %v578_v24 = vpack.c.bf16 %v477_v21, %v476_v20 }
  0x15   :  { %555 = vmatpush1.bf16.msra.mxu1 %v554_v32  ;;  %529 = vmatprep.subr.bf16.mxu0 %v626_v0  ;;  %v602_v19 = vpack.c.bf16 %v497_v17, %v496_v16  ;;  %v605_v25 = vpack.c.bf16 %v499_v23, %v498_v22  ;;  %v478_v26 = vld [vmem:[%s977_s2 + $0x170] sm:$0xff]  ;;  %v479_v27 = vld [vmem:[%s977_s2 + $0x178] sm:$0xff]  ;;  %v480_v32 = vld [vmem:[%s977_s2 + $0x180] sm:$0xff] }
  0x16   :  { %556 = vmatprep.subr.bf16.mxu1 %v626_v0  ;;  %v501_v29 = vld [vmem:[%s977_s2 + $0x210] sm:$0xff]  ;;  %v581_v30 = vpack.c.bf16 %v479_v27, %v478_v26  ;;  %v481_v33 = vld [vmem:[%s977_s2 + $0x188] sm:$0xff]  ;;  %v502_v34 = vld [vmem:[%s977_s2 + $0x218] sm:$0xff] }
  0x17   :  { %v503_v35 = vld [vmem:[%s977_s2 + $0x220] sm:$0xff]  ;;  %v584_v36 = vpack.c.bf16 %v481_v33, %v480_v32  ;;  %v483_v39 = vld [vmem:[%s977_s2 + $0x198] sm:$0xff]  ;;  %v504_v40 = vld [vmem:[%s977_s2 + $0x228] sm:$0xff] }
  0x18   :  { %531 = vmatpush1.bf16.msra.mxu0 %v530_v37  ;;  %v611_v37 = vpack.c.bf16 %v503_v35, %v502_v34  ;;  %v505_v41 = vld [vmem:[%s977_s2 + $0x230] sm:$0xff]  ;;  %v485_v45 = vld [vmem:[%s977_s2 + $0x1a8] sm:$0xff]  ;;  %v506_v46 = vld [vmem:[%s977_s2 + $0x238] sm:$0xff] }
  0x19   :  { %558 = vmatpush1.bf16.msra.mxu1 %v557_v38  ;;  %532 = vmatprep.subr.bf16.mxu0 %v626_v0  ;;  %v482_v38 = vld [vmem:[%s977_s2 + $0x190] sm:$0xff]  ;;  %v507_v47 = vld [vmem:[%s977_s2 + $0x240] sm:$0xff]  ;;  %v508_v52 = vld [vmem:[%s977_s2 + $0x248] sm:$0xff] }
  0x1a   :  { %559 = vmatprep.subr.bf16.mxu1 %v626_v0  ;;  %v587_v42 = vpack.c.bf16 %v483_v39, %v482_v38  ;;  %v617_v49 = vpack.c.bf16 %v507_v47, %v506_v46  ;;  %v509_v53 = vld [vmem:[%s977_s2 + $0x250] sm:$0xff]  ;;  %v488_v56 = vld [vmem:[%s977_s2 + $0x1c0] sm:$0x3f] }
  0x1b   :  { %v620_v55 = vpack.c.bf16 %v509_v53, %v508_v52 }
  0x1c   :  { %534 = vmatpush1.bf16.msra.mxu0 %v533_v43  ;;  %v614_v43 = vpack.c.bf16 %v505_v41, %v504_v40 }
  0x1d   :  { %561 = vmatpush1.bf16.msra.mxu1 %v560_v44  ;;  %535 = vmatprep.subr.bf16.mxu0 %v626_v0  ;;  %v484_v44 = vld [vmem:[%s977_s2 + $0x1a0] sm:$0xff] }
  0x1e   :  { %562 = vmatprep.subr.bf16.mxu1 %v626_v0  ;;  %v590_v48 = vpack.c.bf16 %v485_v45, %v484_v44 }
  0x20   :  { %537 = vmatpush1.bf16.msra.mxu0 %v536_v50  ;;  %v486_v50 = vld [vmem:[%s977_s2 + $0x1b0] sm:$0xff] }
  0x21   :  { %564 = vmatpush1.bf16.msra.mxu1 %v563_v51  ;;  %538 = vmatprep.subr.bf16.mxu0 %v626_v0  ;;  %v487_v51 = vld [vmem:[%s977_s2 + $0x1b8] sm:$0xff] }
  0x22   :  { %565 = vmatprep.subr.bf16.mxu1 %v626_v0  ;;  %v593_v54 = vpack.c.bf16 %v487_v51, %v486_v50 }
  0x24   :  { %540 = vmatpush1.bf16.msra.mxu0 %v539_v57  ;;  %v510_v57 = vld [vmem:[%s977_s2 + $0x258] sm:$0x3f] }
  0x25   :  { %567 = vmatpush1.bf16.msra.mxu1 %v566_v58  ;;  %84 = vmatprep.subr.mxu0 %v628_v61 }
  0x26   :  { %182 = vmatprep.subr.mxu1 %v628_v61 }
  0x28   :  { %445 = vmatpush1.msk.msra.mxu0 %vm44_vm1, %v36_v62 }
  0x29   :  { %113 = vmatmul.mubr.f32.vlgmr.msra.gmra.mrb[0].mxu0 %v810_v2  ;;  %467 = vmatpush1.msk.msra.mxu1 %vm44_vm1, %v466_v3 }
  0x2a   :  { %568 = vmatprep.subr.bf16.mxu0 %v626_v0  ;;  %211 = vmatmul.mubr.f32.vlgmr.msra.gmra.mrb[0].mxu1 %v810_v2 }
  0x2b   :  { %570 = vmatpush1.bf16.msra.mxu0 %v569_v4  ;;  %595 = vmatprep.subr.bf16.mxu1 %v626_v0 }
  0x2c   :  { %597 = vmatpush1.bf16.msra.mxu1 %v596_v5  ;;  %571 = vmatprep.subr.bf16.mxu0 %v626_v0 }
  0x2d   :  { %598 = vmatprep.subr.bf16.mxu1 %v626_v0  ;;  %447 = vmatprep.mubr.msk.f32.mxu0 %vm37_vm0, %v835_v10 }
  0x2e   :  { %118 = vmatmul.mubr.f32.gmra.mrb[2].mxu0 %v841_v12  ;;  %469 = vmatprep.mubr.msk.f32.mxu1 %vm37_vm0, %v835_v10 }
  0x2f   :  { %573 = vmatpush1.bf16.msra.mxu0 %v572_v11  ;;  %216 = vmatmul.mubr.f32.gmra.mrb[2].mxu1 %v841_v12 }
  0x30   :  { %600 = vmatpush1.bf16.msra.mxu1 %v599_v13  ;;  %574 = vmatprep.subr.bf16.mxu0 %v626_v0 }
  0x31   :  { %601 = vmatprep.subr.bf16.mxu1 %v626_v0  ;;  %490 = vmatprep.mubr.msk.f32.mxu0 %vm37_vm0, %v713_v28 }
  0x32   :  { %512 = vmatprep.mubr.msk.f32.mxu1 %vm37_vm0, %v713_v28  ;;  %v500_v28 = vld [vmem:[%s977_s2 + $0x208] sm:$0xff] }
  0x33   :  { %576 = vmatpush1.bf16.msra.mxu0 %v575_v18  ;;  %v608_v31 = vpack.c.bf16 %v501_v29, %v500_v28 }
  0x34   :  { %603 = vmatpush1.bf16.msra.mxu1 %v602_v19  ;;  %577 = vmatprep.subr.bf16.mxu0 %v626_v0 }
  0x35   :  { %604 = vmatprep.subr.bf16.mxu1 %v626_v0 }
  0x37   :  { %579 = vmatpush1.bf16.msra.mxu0 %v578_v24 }
  0x38   :  { %606 = vmatpush1.bf16.msra.mxu1 %v605_v25  ;;  %580 = vmatprep.subr.bf16.mxu0 %v626_v0 }
  0x39   :  { %607 = vmatprep.subr.bf16.mxu1 %v626_v0 }
  0x3b   :  { %582 = vmatpush1.bf16.msra.mxu0 %v581_v30 }
  0x3c   :  { %609 = vmatpush1.bf16.msra.mxu1 %v608_v31  ;;  %583 = vmatprep.subr.bf16.mxu0 %v626_v0 }
  0x3d   :  { %610 = vmatprep.subr.bf16.mxu1 %v626_v0 }
  0x3f   :  { %585 = vmatpush1.bf16.msra.mxu0 %v584_v36 }
  0x40   :  { %612 = vmatpush1.bf16.msra.mxu1 %v611_v37  ;;  %586 = vmatprep.subr.bf16.mxu0 %v626_v0 }
  0x41   :  { %613 = vmatprep.subr.bf16.mxu1 %v626_v0 }
  0x43   :  { %588 = vmatpush1.bf16.msra.mxu0 %v587_v42 }
  0x44   :  { %615 = vmatpush1.bf16.msra.mxu1 %v614_v43  ;;  %589 = vmatprep.subr.bf16.mxu0 %v626_v0 }
  0x45   :  { %616 = vmatprep.subr.bf16.mxu1 %v626_v0 }
  0x47   :  { %591 = vmatpush1.bf16.msra.mxu0 %v590_v48 }
  0x48   :  { %618 = vmatpush1.bf16.msra.mxu1 %v617_v49  ;;  %592 = vmatprep.subr.bf16.mxu0 %v626_v0 }
  0x49   :  { %619 = vmatprep.subr.bf16.mxu1 %v626_v0 }
  0x4b   :  { %594 = vmatpush1.bf16.msra.mxu0 %v593_v54 }
  0x4c   :  { %621 = vmatpush1.bf16.msra.mxu1 %v620_v55  ;;  %282 = vmatprep.subr.mxu0 %v628_v61 }
  0x4d   :  { %382 = vmatprep.subr.mxu1 %v628_v61 }
  0x4f   :  { %489 = vmatpush1.msk.msra.mxu0 %vm44_vm1, %v488_v56 }
  0x50   :  { %311 = vmatmul.mubr.f32.vlgmr.msra.gmra.mrb[4].mxu0 %v810_v2  ;;  %511 = vmatpush1.msk.msra.mxu1 %vm44_vm1, %v510_v57 }
  0x51   :  { %411 = vmatmul.mubr.f32.vlgmr.msra.gmra.mrb[4].mxu1 %v810_v2  ;;  %491 = vmatprep.mubr.msk.f32.mxu0 %vm37_vm0, %v835_v10 }
  0x52   :  { %513 = vmatprep.mubr.msk.f32.mxu1 %vm37_vm0, %v835_v10 }
  0x54   :  { %316 = vmatmul.mubr.f32.gmra.mrb[6].mxu0 %v841_v12 }
  0x55   :  { %416 = vmatmul.mubr.f32.gmra.mrb[6].mxu1 %v841_v12 }
  0x8d   :  { %v428_v8 = vpop.permute.xlu0 %427 }
  0x91   :  { %v433_v19 = vpop.permute.xlu0 %432 }
  0xfc   :  { %v114_v0 = vpop.f32.mrb[0].mxu0 }
  0xfd   :  { %v116_v58 = vpop.f32.mrb[1].mxu0  ;;  %v212_v59 = vpop.f32.mrb[0].mxu1 }
  0xfe   :  { %v221_v60 = vmax.f32 %v114_v0, %v212_v59  ;;  %v214_v61 = vpop.f32.mrb[1].mxu1 }
 0x101   :  { %v119_v62 = vpop.f32.mrb[2].mxu0 }
 0x102   :  { %v121_v63 = vpop.f32.mrb[3].mxu0  ;;  %v217_v1 = vpop.f32.mrb[2].mxu1 }
 0x103   :  { %v222_v3 = vmax.f32 %v119_v62, %v217_v1  ;;  %v219_v2 = vpop.f32.mrb[3].mxu1 }
 0x123   :  { %v312_v4 = vpop.f32.mrb[4].mxu0 }
 0x124   :  { %v321_v5 = vmax.f32 %v221_v60, %v312_v4  ;;  %v314_v6 = vpop.f32.mrb[5].mxu0  ;;  %v412_v7 = vpop.f32.mrb[4].mxu1 }
 0x125   :  { %v414_v9 = vpop.f32.mrb[5].mxu1 }
 0x126   :  { %v421_v10 = vmax.f32 %v321_v5, %v412_v7 }
 0x127   :  { %v317_v11 = vpop.f32.mrb[6].mxu0 }
 0x128   :  { %v435_v13 = vadd.f32 %v428_v8, %v421_v10  ;;  %v322_v12 = vmax.f32 %v222_v3, %v317_v11  ;;  %v319_v14 = vpop.f32.mrb[7].mxu0  ;;  %v417_v15 = vpop.f32.mrb[6].mxu1 }
 0x129   :  { %v419_v16 = vpop.f32.mrb[7].mxu1 }
 0x12a   :  { %v437_v17 = vmax.f32 %v435_v13, 0.0  ;;  %v422_v18 = vmax.f32 %v322_v12, %v417_v15 }
 0x12c   :  { %439 = vst [vmem:[%s980_s3] sm:$0xff] %v437_v17  ;;  %v436_v20 = vadd.f32 %v433_v19, %v422_v18 }
 0x12e   :  { %v438_v21 = vmax.f32 %v436_v20, 0.0 }
 0x130   :  { %440 = vst [vmem:[%s980_s3 + $0x8] sm:$0xff] %v438_v21 }

// kernel: simple_network_forward.5
= control target key start
LH: loop header
LB: loop body
LE: loop exit
PB: predicated region body
PF: predicated region fallthrough
CT: control target
= control target key end

     0   :  { %v732_v4 = vmov 0.0|0.0   ;;  %v733_v26 = vmov 1983009808   ;;  %v90_v28 = vlaneseq  ;;  %vm106_vm0 = vcmask 130048   ;;  %s1072_s0 = inlined_call_operand.vmem [shape: f32[2,400], index: 0, kind: input, shape index: {}]   ;;  %s1073_s1 = inlined_call_operand.vmem [shape: f32[400,128], index: 1, kind: input, shape index: {}]   ;;  %s1074_s2 = inlined_call_operand.vmem [shape: f32[1,128], index: 2, kind: input, shape index: {}]   ;;  %s1075_s3 = inlined_call_operand.vmem [shape: f32[128,128], index: 3, kind: input, shape index: {}]   ;;  %s1076_s4 = inlined_call_operand.vmem [shape: f32[1,128], index: 4, kind: input, shape index: {}]   ;;  %s1077_s5 = inlined_call_operand.vmem [shape: f32[128,128], index: 5, kind: input, shape index: {}]   ;;  %s1078_s6 = inlined_call_operand.vmem [shape: f32[1,128], index: 6, kind: input, shape index: {}]   ;;  %s1079_s7 = inlined_call_operand.hbm [shape: f32[2,128], index: 7, kind: output, shape index: {}]  }
   0x1   :  { %v44_v0 = vld [vmem:[%s1073_s1 + $0x80] sm:$0xff]  ;;  %v45_v1 = vld [vmem:[%s1073_s1 + $0x88] sm:$0xff]  ;;  %627 = vmatprep.subr.bf16.mxu1 %v732_v4  ;;  %v46_v10 = vld [vmem:[%s1073_s1 + $0x90] sm:$0xff]  ;;  %v88_v27 = vunpack.c.l.s4 %v733_v26 }
   0x2   :  { %v28_v2 = vld [vmem:[%s1073_s1] sm:$0xff]  ;;  %v595_v3 = vpack.c.bf16 %v45_v1, %v44_v0  ;;  %v29_v5 = vld [vmem:[%s1073_s1 + $0x8] sm:$0xff]  ;;  %v47_v11 = vld [vmem:[%s1073_s1 + $0x98] sm:$0xff]  ;;  %v91_v39 = vshrl.u32 %v90_v28, 7 }
   0x3   :  { %v60_v6 = vld [vmem:[%s1073_s1 + $0x100] sm:$0xff]  ;;  %v61_v7 = vld [vmem:[%s1073_s1 + $0x108] sm:$0xff]  ;;  %v597_v8 = vpack.c.bf16 %v29_v5, %v28_v2  ;;  %v30_v12 = vld [vmem:[%s1073_s1 + $0x10] sm:$0xff]  ;;  %v599_v13 = vpack.c.bf16 %v47_v11, %v46_v10  ;;  %v89_v38 = vunpack.c.0.s8 %v88_v27 }
   0x4   :  { %v628_v9 = vpack.c.bf16 %v61_v7, %v60_v6  ;;  %596 = vmatprep.subr.bf16.mxu0 %v595_v3  ;;  %v31_v14 = vld [vmem:[%s1073_s1 + $0x18] sm:$0xff]  ;;  %v62_v15 = vld [vmem:[%s1073_s1 + $0x110] sm:$0xff]  ;;  %v48_v19 = vld [vmem:[%s1073_s1 + $0xa0] sm:$0xff] }
   0x5   :  { %v63_v16 = vld [vmem:[%s1073_s1 + $0x118] sm:$0xff]  ;;  %598 = vmatpush3.bf16.msra.mxu0 %v597_v8  ;;  %v601_v17 = vpack.c.bf16 %v31_v14, %v30_v12  ;;  %v49_v20 = vld [vmem:[%s1073_s1 + $0xa8] sm:$0xff]  ;;  %v32_v21 = vld [vmem:[%s1073_s1 + $0x20] sm:$0xff]  ;;  %v92_v49 = vsub.s32 %v89_v38, %v91_v39 }
   0x6   :  { %629 = vmatpush1.bf16.msra.mxu1 %v628_v9  ;;  %v631_v18 = vpack.c.bf16 %v63_v16, %v62_v15  ;;  %600 = vmatprep.subr.bf16.mxu0 %v599_v13  ;;  %v603_v22 = vpack.c.bf16 %v49_v20, %v48_v19  ;;  %v33_v23 = vld [vmem:[%s1073_s1 + $0x28] sm:$0xff]  ;;  %v64_v24 = vld [vmem:[%s1073_s1 + $0x120] sm:$0xff]  ;;  %v50_v29 = vld [vmem:[%s1073_s1 + $0xb0] sm:$0xff] }
   0x7   :  { %630 = vmatprep.subr.bf16.mxu1 %v732_v4  ;;  %v65_v25 = vld [vmem:[%s1073_s1 + $0x128] sm:$0xff]  ;;  %v51_v30 = vld [vmem:[%s1073_s1 + $0xb8] sm:$0xff]  ;;  %v605_v31 = vpack.c.bf16 %v33_v23, %v32_v21  ;;  %v34_v33 = vld [vmem:[%s1073_s1 + $0x30] sm:$0xff] }
   0x8   :  { %v634_v32 = vpack.c.bf16 %v65_v25, %v64_v24  ;;  %v607_v34 = vpack.c.bf16 %v51_v30, %v50_v29  ;;  %v35_v35 = vld [vmem:[%s1073_s1 + $0x38] sm:$0xff]  ;;  %v66_v36 = vld [vmem:[%s1073_s1 + $0x130] sm:$0xff]  ;;  %v52_v40 = vld [vmem:[%s1073_s1 + $0xc0] sm:$0xff] }
   0x9   :  { %602 = vmatpush3.bf16.msra.mxu0 %v601_v17  ;;  %v67_v37 = vld [vmem:[%s1073_s1 + $0x138] sm:$0xff]  ;;  %v53_v41 = vld [vmem:[%s1073_s1 + $0xc8] sm:$0xff]  ;;  %v609_v42 = vpack.c.bf16 %v35_v35, %v34_v33  ;;  %v36_v44 = vld [vmem:[%s1073_s1 + $0x40] sm:$0xff] }
   0xa   :  { %632 = vmatpush1.bf16.msra.mxu1 %v631_v18  ;;  %604 = vmatprep.subr.bf16.mxu0 %v603_v22  ;;  %v637_v43 = vpack.c.bf16 %v67_v37, %v66_v36  ;;  %v611_v45 = vpack.c.bf16 %v53_v41, %v52_v40  ;;  %v37_v46 = vld [vmem:[%s1073_s1 + $0x48] sm:$0xff]  ;;  %v68_v47 = vld [vmem:[%s1073_s1 + $0x140] sm:$0xff]  ;;  %v54_v50 = vld [vmem:[%s1073_s1 + $0xd0] sm:$0xff] }
   0xb   :  { %633 = vmatprep.subr.bf16.mxu1 %v732_v4  ;;  %v69_v48 = vld [vmem:[%s1073_s1 + $0x148] sm:$0xff]  ;;  %v55_v51 = vld [vmem:[%s1073_s1 + $0xd8] sm:$0xff]  ;;  %v613_v52 = vpack.c.bf16 %v37_v46, %v36_v44  ;;  %v38_v54 = vld [vmem:[%s1073_s1 + $0x50] sm:$0xff] }
   0xc   :  { %v640_v53 = vpack.c.bf16 %v69_v48, %v68_v47  ;;  %v27_v55 = vld [vmem:[%s1072_s0] sm:$0xff]  ;;  %v615_v56 = vpack.c.bf16 %v55_v51, %v54_v50  ;;  %v39_v57 = vld [vmem:[%s1073_s1 + $0x58] sm:$0xff]  ;;  %v70_v58 = vld [vmem:[%s1073_s1 + $0x150] sm:$0xff] }
   0xd   :  { %606 = vmatpush3.bf16.msra.mxu0 %v605_v31  ;;  %v71_v59 = vld [vmem:[%s1073_s1 + $0x158] sm:$0xff]  ;;  %v86_v60 = vcombine.high %v27_v55, %v27_v55  ;;  %v93_v61 = vrot.slane %v27_v55, %v92_v49  ;;  %v56_v62 = vld [vmem:[%s1073_s1 + $0xe0] sm:$0xff]  ;;  %v57_v63 = vld [vmem:[%s1073_s1 + $0xe8] sm:$0xff]  ;;  %v617_v2 = vpack.c.bf16 %v39_v57, %v38_v54 }
   0xe   :  { %635 = vmatpush1.bf16.msra.mxu1 %v634_v32  ;;  %608 = vmatprep.subr.bf16.mxu0 %v607_v34  ;;  %v643_v3 = vpack.c.bf16 %v71_v59, %v70_v58  ;;  %v40_v5 = vld [vmem:[%s1073_s1 + $0x60] sm:$0xff]  ;;  %v41_v6 = vld [vmem:[%s1073_s1 + $0x68] sm:$0xff]  ;;  %v619_v7 = vpack.c.bf16 %v57_v63, %v56_v62 }
   0xf   :  { %636 = vmatprep.subr.bf16.mxu1 %v732_v4  ;;  %v101_v0 = vcombine.high %v93_v61, %v93_v61  ;;  %v100_v1 = vrot.slane %v86_v60, %v92_v49  ;;  %v72_v8 = vld [vmem:[%s1073_s1 + $0x160] sm:$0xff]  ;;  %v73_v9 = vld [vmem:[%s1073_s1 + $0x168] sm:$0xff] }
  0x11   :  { %610 = vmatpush3.bf16.msra.mxu0 %v609_v42  ;;  %v102_v10 = vcombine.high %v100_v1, %v100_v1 }
  0x12   :  { %638 = vmatpush1.bf16.msra.mxu1 %v637_v43  ;;  %612 = vmatprep.subr.bf16.mxu0 %v611_v45 }
  0x13   :  { %639 = vmatprep.subr.bf16.mxu1 %v732_v4 }
  0x15   :  { %614 = vmatpush3.bf16.msra.mxu0 %v613_v52 }
  0x16   :  { %641 = vmatpush1.bf16.msra.mxu1 %v640_v53  ;;  %616 = vmatprep.subr.bf16.mxu0 %v615_v56 }
  0x17   :  { %642 = vmatprep.subr.bf16.mxu1 %v732_v4 }
  0x18   :  { %12 = vsyncpa [#allocation3], 0  ;;  %v58_v11 = vld [vmem:[%s1073_s1 + $0xf0] sm:$0xff]  ;;  %v59_v12 = vld [vmem:[%s1073_s1 + $0xf8] sm:$0xff]  ;;  %173 = vmatprep.mubr.f32.mxu0 %v101_v0  ;;  %453 = vmatprep.mubr.msk.f32.mxu1 %vm106_vm0, %v102_v10  ;;  %v621_v13 = vpack.c.bf16 %v41_v6, %v40_v5  ;;  %v646_v14 = vpack.c.bf16 %v73_v9, %v72_v8  ;;  %vm734_vm1 = vmmov 0   ;;  %v735_v49 = vmov 0.0  }
  0x19   :  { %618 = vmatpush3.bf16.msra.mxu0 %v617_v2  ;;  %v42_v15 = vld [vmem:[%s1073_s1 + $0x70] sm:$0xff]  ;;  %v623_v16 = vpack.c.bf16 %v59_v12, %v58_v11  ;;  %v43_v17 = vld [vmem:[%s1073_s1 + $0x78] sm:$0xff]  ;;  %v76_v22 = vld [vmem:[%s1073_s1 + $0x180] sm:$0xff]  ;;  %s736_s25 = smov [#allocation2]  }
  0x1a   :  { %644 = vmatpush1.bf16.msra.mxu1 %v643_v3  ;;  %620 = vmatprep.subr.bf16.mxu0 %v619_v7  ;;  %v74_v18 = vld [vmem:[%s1073_s1 + $0x170] sm:$0xff]  ;;  %v75_v19 = vld [vmem:[%s1073_s1 + $0x178] sm:$0xff]  ;;  %v625_v20 = vpack.c.bf16 %v43_v17, %v42_v15  ;;  %v77_v23 = vld [vmem:[%s1073_s1 + $0x188] sm:$0xff]  ;;  %s444_s26 = sshll.u32 %s736_s25, 4  ;;  %s445_s26 = int_to_ptr.vmem [resolvable:$true] %s444_s26 }
  0x1b   :  { %645 = vmatprep.subr.bf16.mxu1 %v732_v4  ;;  %v649_v21 = vpack.c.bf16 %v75_v19, %v74_v18  ;;  %v250_v24 = vld [vmem:[%s1075_s3] sm:$0xff]  ;;  %v251_v25 = vld [vmem:[%s1075_s3 + $0x8] sm:$0xff]  ;;  %v652_v26 = vpack.c.bf16 %v77_v23, %v76_v22  ;;  %v252_v28 = vld [vmem:[%s1075_s3 + $0x10] sm:$0xff]  ;;  %p713_p1 = scmp.lt.s32.totalorder %s445_s26, %s445_s26 }
  0x1c   :  { %v655_v27 = vpack.c.bf16 %v251_v25, %v250_v24  ;;  %v253_v29 = vld [vmem:[%s1075_s3 + $0x18] sm:$0xff]  ;;  %v254_v31 = vld [vmem:[%s1075_s3 + $0x20] sm:$0xff]  ;;  %v255_v32 = vld [vmem:[%s1075_s3 + $0x28] sm:$0xff] }
  0x1d   :  { %622 = vmatpush3.bf16.msra.mxu0 %v621_v13  ;;  %v658_v30 = vpack.c.bf16 %v253_v29, %v252_v28  ;;  %v661_v33 = vpack.c.bf16 %v255_v32, %v254_v31  ;;  %v256_v34 = vld [vmem:[%s1075_s3 + $0x30] sm:$0xff]  ;;  %v257_v35 = vld [vmem:[%s1075_s3 + $0x38] sm:$0xff]  ;;  %v258_v37 = vld [vmem:[%s1075_s3 + $0x40] sm:$0xff] }
  0x1e   :  { %647 = vmatpush1.bf16.msra.mxu1 %v646_v14  ;;  %624 = vmatprep.subr.bf16.mxu0 %v623_v16  ;;  %v664_v36 = vpack.c.bf16 %v257_v35, %v256_v34  ;;  %v259_v38 = vld [vmem:[%s1075_s3 + $0x48] sm:$0xff]  ;;  %v260_v40 = vld [vmem:[%s1075_s3 + $0x50] sm:$0xff]  ;;  %v261_v41 = vld [vmem:[%s1075_s3 + $0x58] sm:$0xff] }
  0x1f   :  { %648 = vmatprep.subr.bf16.mxu1 %v732_v4  ;;  %v667_v39 = vpack.c.bf16 %v259_v38, %v258_v37  ;;  %v670_v42 = vpack.c.bf16 %v261_v41, %v260_v40  ;;  %v262_v43 = vld [vmem:[%s1075_s3 + $0x60] sm:$0xff]  ;;  %v263_v44 = vld [vmem:[%s1075_s3 + $0x68] sm:$0xff]  ;;  %v264_v46 = vld [vmem:[%s1075_s3 + $0x70] sm:$0xff] }
  0x20   :  { %v673_v45 = vpack.c.bf16 %v263_v44, %v262_v43  ;;  %v265_v47 = vld [vmem:[%s1075_s3 + $0x78] sm:$0xff]  ;;  %v344_v50 = vld [vmem:[%s1077_s5] sm:$0xff]  ;;  %v345_v51 = vld [vmem:[%s1077_s5 + $0x8] sm:$0xff] }
  0x21   :  { %626 = vmatpush3.bf16.msra.mxu0 %v625_v20  ;;  %v676_v48 = vpack.c.bf16 %v265_v47, %v264_v46  ;;  %v346_v52 = vld [vmem:[%s1077_s5 + $0x10] sm:$0xff]  ;;  %v679_v53 = vpack.c.bf16 %v345_v51, %v344_v50  ;;  %v347_v54 = vld [vmem:[%s1077_s5 + $0x18] sm:$0xff]  ;;  %v348_v56 = vld [vmem:[%s1077_s5 + $0x20] sm:$0xff] }
  0x22   :  { %650 = vmatpush1.bf16.msra.mxu1 %v649_v21  ;;  %654 = vmatprep.subr.bf16.mxu0 %v732_v4  ;;  %v682_v55 = vpack.c.bf16 %v347_v54, %v346_v52  ;;  %v349_v57 = vld [vmem:[%s1077_s5 + $0x28] sm:$0xff]  ;;  %v350_v59 = vld [vmem:[%s1077_s5 + $0x30] sm:$0xff]  ;;  %v351_v60 = vld [vmem:[%s1077_s5 + $0x38] sm:$0xff] }
  0x23   :  { %651 = vmatprep.subr.bf16.mxu1 %v732_v4  ;;  %v685_v58 = vpack.c.bf16 %v349_v57, %v348_v56  ;;  %v352_v62 = vld [vmem:[%s1077_s5 + $0x40] sm:$0xff]  ;;  %v353_v63 = vld [vmem:[%s1077_s5 + $0x48] sm:$0xff]  ;;  %v355_v2 = vld [vmem:[%s1077_s5 + $0x58] sm:$0xff] }
  0x24   :  { %174 = vmatmul.mubr.f32.vlgmr.msra.gmra.mrb[0].mxu0 %v93_v61  ;;  %v688_v61 = vpack.c.bf16 %v351_v60, %v350_v59  ;;  %v691_v0 = vpack.c.bf16 %v353_v63, %v352_v62  ;;  %v356_v5 = vld [vmem:[%s1077_s5 + $0x60] sm:$0xff]  ;;  %v357_v6 = vld [vmem:[%s1077_s5 + $0x68] sm:$0xff]  ;;  %v358_v17 = vld [vmem:[%s1077_s5 + $0x70] sm:$0xff] }
  0x25   :  { %656 = vmatpush3.bf16.msra.mxu0 %v655_v27  ;;  %557 = vmatprep.mubr.msk.f32.mxu0 %vm734_vm1, %v735_v49  ;;  %v697_v7 = vpack.c.bf16 %v357_v6, %v356_v5  ;;  %v452_v10 = vld [vmem:[%s1074_s2] ss:$0 sm:$0xff] }
  0x26   :  { %653 = vmatpush1.bf16.msra.mxu1 %v652_v26  ;;  %657 = vmatprep.subr.bf16.mxu0 %v732_v4  ;;  %v454_v19 = vld [vmem:[%s1076_s4] ss:$0 sm:$0xff] }
  0x27   :  { %678 = vmatprep.subr.bf16.mxu1 %v732_v4  ;;  %v455_v24 = vld [vmem:[%s1078_s6] ss:$0 sm:$0xff] }
  0x29   :  { %244 = vmatmul.mubr.f32.vlgmr.msra.gmra.mrb[0].mxu1 %v100_v1  ;;  %659 = vmatpush3.bf16.msra.mxu0 %v658_v30  ;;  %v354_v1 = vld [vmem:[%s1077_s5 + $0x50] sm:$0xff] }
  0x2a   :  { %660 = vmatprep.subr.bf16.mxu0 %v732_v4  ;;  %592 = vmatprep.mubr.msk.f32.mxu1 %vm734_vm1, %v735_v49  ;;  %v694_v3 = vpack.c.bf16 %v355_v2, %v354_v1 }
  0x2b   :  { %680 = vmatpush3.bf16.msra.mxu1 %v679_v53 }
  0x2c   :  { %681 = vmatprep.subr.bf16.mxu1 %v732_v4 }
  0x2d   :  { %662 = vmatpush3.bf16.msra.mxu0 %v661_v33 }
  0x2e   :  { %663 = vmatprep.subr.bf16.mxu0 %v732_v4 }
  0x2f   :  { %683 = vmatpush3.bf16.msra.mxu1 %v682_v55 }
  0x30   :  { %684 = vmatprep.subr.bf16.mxu1 %v732_v4 }
  0x31   :  { %665 = vmatpush3.bf16.msra.mxu0 %v664_v36 }
  0x32   :  { %666 = vmatprep.subr.bf16.mxu0 %v732_v4 }
  0x33   :  { %686 = vmatpush3.bf16.msra.mxu1 %v685_v58 }
  0x34   :  { %687 = vmatprep.subr.bf16.mxu1 %v732_v4 }
  0x35   :  { %668 = vmatpush3.bf16.msra.mxu0 %v667_v39 }
  0x36   :  { %669 = vmatprep.subr.bf16.mxu0 %v732_v4 }
  0x37   :  { %689 = vmatpush3.bf16.msra.mxu1 %v688_v61 }
  0x38   :  { %690 = vmatprep.subr.bf16.mxu1 %v732_v4 }
  0x39   :  { %671 = vmatpush3.bf16.msra.mxu0 %v670_v42 }
  0x3a   :  { %672 = vmatprep.subr.bf16.mxu0 %v732_v4 }
  0x3b   :  { %692 = vmatpush3.bf16.msra.mxu1 %v691_v0 }
  0x3c   :  { %693 = vmatprep.subr.bf16.mxu1 %v732_v4 }
  0x3d   :  { %674 = vmatpush3.bf16.msra.mxu0 %v673_v45 }
  0x3e   :  { %675 = vmatprep.subr.bf16.mxu0 %v732_v4 }
  0x3f   :  { %695 = vmatpush3.bf16.msra.mxu1 %v694_v3 }
  0x40   :  { %696 = vmatprep.subr.bf16.mxu1 %v732_v4 }
  0x41   :  { %677 = vmatpush3.bf16.msra.mxu0 %v676_v48 }
  0x43   :  { %698 = vmatpush3.bf16.msra.mxu1 %v697_v7 }
  0x44   :  { %699 = vmatprep.subr.bf16.mxu1 %v732_v4  ;;  %v359_v4 = vld [vmem:[%s1077_s5 + $0x78] sm:$0xff]  ;;  %s708_s5 = scalar_lea.vmem %s445_s26, 32 }
  0x45   :  { %v700_v18 = vpack.c.bf16 %v359_v4, %v358_v17  ;;  %p709_p0 = scmp.ne.s32.totalorder %s445_s26, %s708_s5  ;;  %p714_p2 = scmp.lt.s32.totalorder %s708_s5, %s708_s5 }
  0x47   :  { %701 = vmatpush3.bf16.msra.mxu1 %v700_v18  ;;  %p715_p3 = por %p714_p2, %p713_p1 }
  0x49   :  { %p716_p4 = pnand %p715_p3, %p709_p0 }
  0xf7   :  { %v488_v8 = vpop.f32.mrb[0].mxu0 }
  0xf8   :  { %v489_v9 = vpop.f32.mrb[1].mxu0 }
  0xf9   :  { %v490_v11 = vadd.f32 %v489_v9, %v488_v8 }
  0xfb   :  { %v176_v12 = vadd.f32 %v490_v11, %v452_v10 }
  0xfc   :  { %v245_v13 = vpop.f32.mrb[0].mxu1 }
  0xfd   :  { %v247_v14 = vpop.f32.mrb[1].mxu1  ;;  %v246_v15 = vadd.f32 %v245_v13, %v176_v12 }
  0xff   :  { %v249_v16 = vmax.f32 %v246_v15, 0.0 }
 0x101   :  { %558 = vmatmul.mubr.f32.vlgmr.msra.gmra.mrb[2].mxu0 %v249_v16 }
 0x1d4   :  { %v339_v20 = vpop.f32.mrb[2].mxu0 }
 0x1d5   :  { %v340_v21 = vadd.f32 %v454_v19, %v339_v20  ;;  %v559_v22 = vpop.f32.mrb[3].mxu0 }
 0x1d7   :  { %v343_v23 = vmax.f32 %v340_v21, 0.0 }
 0x1d9   :  { %593 = vmatmul.mubr.f32.vlgmr.msra.gmra.mrb[2].mxu1 %v343_v23 }
 0x2ac   :  { %v433_v25 = vpop.f32.mrb[2].mxu1 }
 0x2ad   :  { %v434_v26 = vadd.f32 %v455_v24, %v433_v25  ;;  %v594_v27 = vpop.f32.mrb[3].mxu1 }
 0x2af   :  { %437 = vst [vmem:[#allocation2] sm:$0x3] %v434_v26 }
 0x2b0   :  { %719 = shalt.err (!%p716_p4)
}
 0x2b1   :  { %s720_s28 = scalar_lea.hbm %s1079_s7, 32 }
 0x2b2   :  { %p721_p5 = scmp.ne.s32.totalorder %s1079_s7, %s720_s28  ;;  %p724_p6 = scmp.lt.u32.totalorder %s720_s28, %s1079_s7 }
 0x2b4   :  { %p726_p7 = pnand %p724_p6, %p721_p5 }
 0x2b6   :  { %729 = shalt.err (!%p726_p7)
}
 0x2b7   :  { %447 = dma.vmem_to_hbm [thread:$0]  %s445_s26, 32, %s1079_s7, [#allocation3]  }
 0x2b8   :  { %730 = dma.done.wait [#allocation3], 32  }
 0x2b9   :  { %731 = vsyncadd [#allocation3], 4294967264 }
 0x2ba   :  { %451 = vsyncpa [#allocation3], 1 }

</bundles_post_ra>
